<compile_context>
chip_gen: v6e
topology: v6e:2x2x1
jax: 0.10.0
libtpu: 0.0.40
codegen_flags: <defaults>
</compile_context>

<pallas_src>
import jax
import jax.numpy as jnp
from jax.experimental import pallas as pl
from jax.experimental.pallas import tpu as pltpu


def _joint_kernel(x_ref, adj_ref, ef_ref,
                  wg_ref, bg_ref, wg1_ref, bg1_ref, wh_ref, bh_ref,
                  out_ref):
    G, N, D = x_ref.shape

    x = x_ref[...]                                     # (G, N, D) f32
    adj = adj_ref[...].astype(jnp.float32)             # (G, N, N) int8 -> f32
    ef = ef_ref[...]                                    # (G, N, N) f32

    # Edge weights: 1 / (edge_feat^2 + 1e-6), masked by adjacency.
    a = adj * pl.reciprocal(ef * ef + 1e-6, approx=False)   # (G, N, N)

    # GIN layer 1 (eps=0, 'sum'): h1 = Lin(x + A @ x).
    # Batched aggregation, then one big (G*N, D) @ (D, D) MXU matmul.
    agg0 = jnp.einsum('gij,gjd->gid', a, x, preferred_element_type=jnp.float32)
    h1 = jnp.dot((x + agg0).reshape(G * N, D), wg_ref[...],
                 preferred_element_type=jnp.float32) + bg_ref[...]
    h1 = h1.reshape(G, N, D)

    # GIN layer 2: h2 = Lin1(h1 + A @ h1).
    agg1 = jnp.einsum('gij,gjd->gid', a, h1, preferred_element_type=jnp.float32)
    h2 = jnp.dot((h1 + agg1).reshape(G * N, D), wg1_ref[...],
                 preferred_element_type=jnp.float32) + bg1_ref[...]

    # Residual (use_lm=True) + per-graph mean pool.
    node_output = h2.reshape(G, N, D) + x               # (G, N, D)
    g_repr = jnp.mean(node_output, axis=1)               # (G, D)

    # Head: (D -> C_pad, zero-padded, pre-transposed) + Tanh; dense (G, C_pad) store.
    logits = jnp.dot(g_repr, wh_ref[...],
                     preferred_element_type=jnp.float32) + bh_ref[...]
    out_ref[...] = jnp.tanh(logits).astype(out_ref.dtype)


def classifier_joint_forward(node_feat0, adj, edge_feat,
                             wg, bg, wg1, bg1, wh, bh,
                             graphs_per_step=8):
    """Batched ClassifierJoint post-LM forward.

    node_feat0: (B, N, D) f32   -- cat(lm_embedding[1:-1], node_feat)
    adj:        (B, N, N)       -- 0/1 dense adjacency (no self loops)
    edge_feat:  (B, N, N) f32   -- per-edge features
    wg, wg1:    (D, D) torch-layout Linear weights; bg, bg1: (D,)
    wh:         (C, D) torch-layout head weight;    bh: (C,)
    returns:    (B, C) f32
    """
    B, N, D = node_feat0.shape
    C = wh.shape[0]
    C_pad = ((C + 127) // 128) * 128

    G = max(1, min(graphs_per_step, B))
    num_steps = (B + G - 1) // G
    Bp = num_steps * G

    # One-time wrapper transposes (torch (out,in) -> (in,out)); zero-pad the
    # head to a lane-dense width.  Weights stay lane-dense inside the kernel.
    wg_t = jnp.asarray(wg, jnp.float32).T                         # (D, D)
    wg1_t = jnp.asarray(wg1, jnp.float32).T                       # (D, D)
    wh_t = jnp.zeros((D, C_pad), jnp.float32).at[:, :C].set(
        jnp.asarray(wh, jnp.float32).T)                           # (D, C_pad)
    bg_r = jnp.asarray(bg, jnp.float32).reshape(1, D)
    bg1_r = jnp.asarray(bg1, jnp.float32).reshape(1, D)
    bh_r = jnp.zeros((1, C_pad), jnp.float32).at[0, :C].set(
        jnp.asarray(bh, jnp.float32))

    # Adjacency shipped as int8 (4x smaller DMA stream); cast back in-kernel.
    x = node_feat0.astype(jnp.float32)
    adj_i8 = adj.astype(jnp.int8)
    ef = edge_feat.astype(jnp.float32)

    # Pad the batch to a multiple of G (padded graphs are sliced off at the end).
    if Bp != B:
        pad = Bp - B
        x = jnp.concatenate([x, jnp.zeros((pad, N, D), x.dtype)], axis=0)
        adj_i8 = jnp.concatenate([adj_i8, jnp.zeros((pad, N, N), jnp.int8)], axis=0)
        ef = jnp.concatenate([ef, jnp.ones((pad, N, N), ef.dtype)], axis=0)

    # VMEM budget: double-buffered pipelined blocks + single-buffered weights
    # + headroom for in-kernel temporaries; re-derived per call so the same
    # code fits v7x's 64 MiB as well as v5e/v6e's 128 MiB.
    blk_bytes = 2 * (G * N * D * 4 + G * N * N * (1 + 4) + G * C_pad * 4)
    wgt_bytes = 2 * D * D * 4 + D * C_pad * 4 + (2 * D + C_pad) * 4
    tmp_bytes = 8 * G * N * D * 4 + 3 * G * N * N * 4
    vmem_limit = int(min(max(2 * (blk_bytes + wgt_bytes + tmp_bytes), 8 << 20),
                         56 << 20))

    vmem_space = pltpu.MemorySpace.VMEM

    out = pl.pallas_call(
        _joint_kernel,
        out_shape=jax.ShapeDtypeStruct((num_steps, G, C_pad), jnp.float32),
        grid_spec=pltpu.PrefetchScalarGridSpec(
            num_scalar_prefetch=0,
            grid=(num_steps,),
            in_specs=[
                pl.BlockSpec((G, N, D), lambda g: (g, 0, 0)),   # node_feat0
                pl.BlockSpec((G, N, N), lambda g: (g, 0, 0)),   # adj (int8)
                pl.BlockSpec((G, N, N), lambda g: (g, 0, 0)),   # edge_feat
                pl.BlockSpec(memory_space=vmem_space),          # gin weight^T
                pl.BlockSpec(memory_space=vmem_space),          # gin bias
                pl.BlockSpec(memory_space=vmem_space),          # gin1 weight^T
                pl.BlockSpec(memory_space=vmem_space),          # gin1 bias
                pl.BlockSpec(memory_space=vmem_space),          # head weight^T (padded)
                pl.BlockSpec(memory_space=vmem_space),          # head bias (padded)
            ],
            out_specs=pl.BlockSpec((None, G, C_pad), lambda g: (g, 0, 0)),
        ),
        compiler_params=pltpu.CompilerParams(
            dimension_semantics=("parallel",),
            vmem_limit_bytes=vmem_limit),
    )(x, adj_i8, ef, wg_t, bg_r, wg1_t, bg1_r, wh_t, bh_r)

    return out.reshape(Bp, C_pad)[:B, :C]                # (B, C)


def reference(node_feat0, adj, edge_feat, wg, bg, wg1, bg1, wh, bh):
    hi = jax.lax.Precision.HIGHEST
    a = adj * (1.0 / (edge_feat ** 2 + 1e-6))

    def one(x, a_mat):
        h1 = jnp.dot(x + jnp.dot(a_mat, x, precision=hi), wg.T, precision=hi) + bg
        h2 = jnp.dot(h1 + jnp.dot(a_mat, h1, precision=hi), wg1.T, precision=hi) + bg1
        node_output = h2 + x
        g = jnp.mean(node_output, axis=0)
        return jnp.tanh(jnp.dot(g, wh.T, precision=hi) + bh)

    return jax.vmap(one)(node_feat0, a)


if __name__ == "__main__":
    # Small shapes consistent with the module: cls_num=2, a batch of 16 graphs
    # of 8 residues each; node_emb_size = lm_dim + nf_dim = 256 (1280 in the
    # real model).  graphs_per_step=8 -> grid of 2 steps, so both v7x cores work.
    B = 16
    N = 8
    lm_dim = 128      # stand-in for ProtBERT hidden size (1024 in the real model)
    nf_dim = 128
    D = lm_dim + nf_dim
    C = 2

    key = jax.random.PRNGKey(0)
    ks = jax.random.split(key, 5)

    # Synthetic frozen-LM output (incl. [CLS]/[SEP] rows) and extra node features.
    lm_embedding = jax.random.normal(ks[0], (B, N + 2, lm_dim), dtype=jnp.float32)
    node_feat = jax.random.normal(ks[1], (B, N, nf_dim), dtype=jnp.float32)
    node_feat0 = jnp.concatenate([lm_embedding[:, 1:-1, :], node_feat], axis=-1)  # (B, N, D)

    # Dense symmetric 0/1 adjacency (no self loops) + positive edge features.
    adj = (jax.random.uniform(ks[2], (B, N, N)) < 0.4).astype(jnp.float32)
    adj = jnp.maximum(adj, jnp.swapaxes(adj, 1, 2))
    adj = adj * (1.0 - jnp.eye(N, dtype=jnp.float32))
    edge_feat = jax.random.uniform(ks[3], (B, N, N), minval=0.5, maxval=2.0,
                                   dtype=jnp.float32)

    # nn.Linear-style parameters in torch (out_features, in_features) layout.
    def init_linear(kw, kb, out_f, in_f):
        bound = 1.0 / (in_f ** 0.5)
        w = jax.random.uniform(kw, (out_f, in_f), minval=-bound, maxval=bound,
                               dtype=jnp.float32)
        b = jax.random.uniform(kb, (out_f,), minval=-bound, maxval=bound,
                               dtype=jnp.float32)
        return w, b

    k_gw, k_gb, k_g1w, k_g1b, k_hw, k_hb = jax.random.split(ks[4], 6)
    wg, bg = init_linear(k_gw, k_gb, D, D)
    wg1, bg1 = init_linear(k_g1w, k_g1b, D, D)
    wh, bh = init_linear(k_hw, k_hb, C, D)

    pred = classifier_joint_forward(node_feat0, adj, edge_feat,
                                    wg, bg, wg1, bg1, wh, bh,
                                    graphs_per_step=8)
    pred = jax.block_until_ready(pred)

    ref = reference(node_feat0, adj, edge_feat, wg, bg, wg1, bg1, wh, bh)
    assert pred.shape == (B, C)
    assert jnp.allclose(pred, ref, atol=2e-4, rtol=2e-4), (pred, ref)

    print("KERNEL_OK")
</pallas_src>

<mosaic_0001>
module attributes {stable_mosaic.version = 11 : i64} {
  func.func @_joint_kernel(%arg0: i32, %arg1: memref<8x8x256xf32, #tpu.memory_space<vmem>>, %arg2: memref<8x8x8xi8, #tpu.memory_space<vmem>>, %arg3: memref<8x8x8xf32, #tpu.memory_space<vmem>>, %arg4: memref<256x256xf32, #tpu.memory_space<vmem>>, %arg5: memref<1x256xf32, #tpu.memory_space<vmem>>, %arg6: memref<256x256xf32, #tpu.memory_space<vmem>>, %arg7: memref<1x256xf32, #tpu.memory_space<vmem>>, %arg8: memref<256x128xf32, #tpu.memory_space<vmem>>, %arg9: memref<1x128xf32, #tpu.memory_space<vmem>>, %arg10: memref<1x8x128xf32, #tpu.memory_space<vmem>>) attributes {dimension_semantics = [#tpu.dimension_semantics<parallel>], iteration_bounds = array<i64: 2>, scalar_prefetch = 0 : i64, scratch_operands = 0 : i64, tpu.core_type = #tpu.core_type<tc>, window_params = [{transform_indices = @transform_0, window_bounds = array<i64: 8, 8, 256>}, {transform_indices = @transform_1, window_bounds = array<i64: 8, 8, 8>}, {transform_indices = @transform_2, window_bounds = array<i64: 8, 8, 8>}, {pipeline_mode = #tpu.pipeline_mode<synchronous>, transform_indices = @transform_3, window_bounds = array<i64: 256, 256>}, {pipeline_mode = #tpu.pipeline_mode<synchronous>, transform_indices = @transform_4, window_bounds = array<i64: 1, 256>}, {pipeline_mode = #tpu.pipeline_mode<synchronous>, transform_indices = @transform_5, window_bounds = array<i64: 256, 256>}, {pipeline_mode = #tpu.pipeline_mode<synchronous>, transform_indices = @transform_6, window_bounds = array<i64: 1, 256>}, {pipeline_mode = #tpu.pipeline_mode<synchronous>, transform_indices = @transform_7, window_bounds = array<i64: 256, 128>}, {pipeline_mode = #tpu.pipeline_mode<synchronous>, transform_indices = @transform_8, window_bounds = array<i64: 1, 128>}, {transform_indices = @transform_9, window_bounds = array<i64: 1, 8, 128>}]} {
    %c0 = arith.constant 0 : index
    %c0_0 = arith.constant 0 : index
    %c0_1 = arith.constant 0 : index
    %0 = vector.load %arg1[%c0, %c0_0, %c0_1] : memref<8x8x256xf32, #tpu.memory_space<vmem>>, vector<8x8x256xf32>
    %c0_2 = arith.constant 0 : index
    %c0_3 = arith.constant 0 : index
    %c0_4 = arith.constant 0 : index
    %1 = vector.load %arg2[%c0_2, %c0_3, %c0_4] : memref<8x8x8xi8, #tpu.memory_space<vmem>>, vector<8x8x8xi8>
    %2 = arith.sitofp %1 : vector<8x8x8xi8> to vector<8x8x8xf32>
    %c0_5 = arith.constant 0 : index
    %c0_6 = arith.constant 0 : index
    %c0_7 = arith.constant 0 : index
    %3 = vector.load %arg3[%c0_5, %c0_6, %c0_7] : memref<8x8x8xf32, #tpu.memory_space<vmem>>, vector<8x8x8xf32>
    %4 = arith.mulf %3, %3 : vector<8x8x8xf32>
    %cst = arith.constant 9.99999997E-7 : f32
    %5 = vector.broadcast %cst : f32 to vector<8x8x8xf32>
    %6 = arith.addf %4, %5 : vector<8x8x8xf32>
    %7 = tpu.reciprocal %6 : vector<8x8x8xf32> -> vector<8x8x8xf32>
    %8 = arith.mulf %2, %7 : vector<8x8x8xf32>
    "tpu.trace_start"() <{level = 10 : i32, message = "gij,gjd->gid"}> : () -> ()
    %cst_8 = arith.constant dense<0.000000e+00> : vector<8x8x256xf32>
    %9 = tpu.matmul %8, %0, %cst_8 {dimension_numbers = #tpu.dot_dimension_numbers<[2], [1], [1], [2], [0, 0, 0, 1, 1, 2], [0], [0]>} : vector<8x8x8xf32>, vector<8x8x256xf32>, vector<8x8x256xf32> -> vector<8x8x256xf32>
    "tpu.trace_stop"() : () -> ()
    %10 = arith.addf %0, %9 : vector<8x8x256xf32>
    %11 = vector.shape_cast %10 : vector<8x8x256xf32> to vector<64x256xf32>
    %c0_9 = arith.constant 0 : index
    %c0_10 = arith.constant 0 : index
    %12 = vector.load %arg4[%c0_9, %c0_10] : memref<256x256xf32, #tpu.memory_space<vmem>>, vector<256x256xf32>
    %cst_11 = arith.constant dense<0.000000e+00> : vector<64x256xf32>
    %13 = tpu.matmul %11, %12, %cst_11 {dimension_numbers = #tpu.dot_dimension_numbers<[1], [0], [0], [1], [0, 0, 1, 1], [], []>} : vector<64x256xf32>, vector<256x256xf32>, vector<64x256xf32> -> vector<64x256xf32>
    %c0_12 = arith.constant 0 : index
    %c0_13 = arith.constant 0 : index
    %14 = vector.load %arg5[%c0_12, %c0_13] : memref<1x256xf32, #tpu.memory_space<vmem>>, vector<1x256xf32>
    %15 = vector.broadcast %14 : vector<1x256xf32> to vector<64x256xf32>
    %16 = arith.addf %13, %15 : vector<64x256xf32>
    %17 = vector.shape_cast %16 : vector<64x256xf32> to vector<8x8x256xf32>
    "tpu.trace_start"() <{level = 10 : i32, message = "gij,gjd->gid"}> : () -> ()
    %cst_14 = arith.constant dense<0.000000e+00> : vector<8x8x256xf32>
    %18 = tpu.matmul %8, %17, %cst_14 {dimension_numbers = #tpu.dot_dimension_numbers<[2], [1], [1], [2], [0, 0, 0, 1, 1, 2], [0], [0]>} : vector<8x8x8xf32>, vector<8x8x256xf32>, vector<8x8x256xf32> -> vector<8x8x256xf32>
    "tpu.trace_stop"() : () -> ()
    %19 = arith.addf %17, %18 : vector<8x8x256xf32>
    %20 = vector.shape_cast %19 : vector<8x8x256xf32> to vector<64x256xf32>
    %c0_15 = arith.constant 0 : index
    %c0_16 = arith.constant 0 : index
    %21 = vector.load %arg6[%c0_15, %c0_16] : memref<256x256xf32, #tpu.memory_space<vmem>>, vector<256x256xf32>
    %cst_17 = arith.constant dense<0.000000e+00> : vector<64x256xf32>
    %22 = tpu.matmul %20, %21, %cst_17 {dimension_numbers = #tpu.dot_dimension_numbers<[1], [0], [0], [1], [0, 0, 1, 1], [], []>} : vector<64x256xf32>, vector<256x256xf32>, vector<64x256xf32> -> vector<64x256xf32>
    %c0_18 = arith.constant 0 : index
    %c0_19 = arith.constant 0 : index
    %23 = vector.load %arg7[%c0_18, %c0_19] : memref<1x256xf32, #tpu.memory_space<vmem>>, vector<1x256xf32>
    %24 = vector.broadcast %23 : vector<1x256xf32> to vector<64x256xf32>
    %25 = arith.addf %22, %24 : vector<64x256xf32>
    %26 = vector.shape_cast %25 : vector<64x256xf32> to vector<8x8x256xf32>
    %27 = arith.addf %26, %0 : vector<8x8x256xf32>
    %cst_20 = arith.constant dense<0.000000e+00> : vector<8x256xf32>
    %28 = vector.multi_reduction <add>, %27, %cst_20 [1] : vector<8x8x256xf32> to vector<8x256xf32>
    %cst_21 = arith.constant 8.000000e+00 : f32
    %29 = vector.broadcast %cst_21 : f32 to vector<8x256xf32>
    %30 = arith.divf %28, %29 : vector<8x256xf32>
    %c0_22 = arith.constant 0 : index
    %c0_23 = arith.constant 0 : index
    %31 = vector.load %arg8[%c0_22, %c0_23] : memref<256x128xf32, #tpu.memory_space<vmem>>, vector<256x128xf32>
    %cst_24 = arith.constant dense<0.000000e+00> : vector<8x128xf32>
    %32 = tpu.matmul %30, %31, %cst_24 {dimension_numbers = #tpu.dot_dimension_numbers<[1], [0], [0], [1], [0, 0, 1, 1], [], []>} : vector<8x256xf32>, vector<256x128xf32>, vector<8x128xf32> -> vector<8x128xf32>
    %c0_25 = arith.constant 0 : index
    %c0_26 = arith.constant 0 : index
    %33 = vector.load %arg9[%c0_25, %c0_26] : memref<1x128xf32, #tpu.memory_space<vmem>>, vector<1x128xf32>
    %34 = vector.broadcast %33 : vector<1x128xf32> to vector<8x128xf32>
    %35 = arith.addf %32, %34 : vector<8x128xf32>
    %36 = math.tanh %35 : vector<8x128xf32>
    %c0_27 = arith.constant 0 : index
    %c0_28 = arith.constant 0 : index
    %c0_29 = arith.constant 0 : index
    %37 = vector.load %arg10[%c0_27, %c0_28, %c0_29] : memref<1x8x128xf32, #tpu.memory_space<vmem>>, vector<1x8x128xf32>
    %38 = vector.shape_cast %37 : vector<1x8x128xf32> to vector<8x128xf32>
    %39 = vector.shape_cast %36 : vector<8x128xf32> to vector<1x8x128xf32>
    tpu.vector_store %arg10[%c0_27, %c0_28, %c0_29], %39 {strides = array<i32>} : memref<1x8x128xf32, #tpu.memory_space<vmem>>, vector<1x8x128xf32>,
    return
  }
  func.func @transform_0(%arg0: i32) -> (i32, i32, i32) {
    %c0_i32 = arith.constant 0 : i32
    %c0_i32_0 = arith.constant 0 : i32
    %c0_i32_1 = arith.constant 0 : i32
    return %arg0, %c0_i32, %c0_i32_0 : i32, i32, i32
  }
  func.func @transform_1(%arg0: i32) -> (i32, i32, i32) {
    %c0_i32 = arith.constant 0 : i32
    %c0_i32_0 = arith.constant 0 : i32
    %c0_i32_1 = arith.constant 0 : i32
    return %arg0, %c0_i32, %c0_i32_0 : i32, i32, i32
  }
  func.func @transform_2(%arg0: i32) -> (i32, i32, i32) {
    %c0_i32 = arith.constant 0 : i32
    %c0_i32_0 = arith.constant 0 : i32
    %c0_i32_1 = arith.constant 0 : i32
    return %arg0, %c0_i32, %c0_i32_0 : i32, i32, i32
  }
  func.func @transform_3(%arg0: i32) -> (i32, i32) {
    %c0_i32 = arith.constant 0 : i32
    %c0_i32_0 = arith.constant 0 : i32
    %c0_i32_1 = arith.constant 0 : i32
    return %c0_i32, %c0_i32_0 : i32, i32
  }
  func.func @transform_4(%arg0: i32) -> (i32, i32) {
    %c0_i32 = arith.constant 0 : i32
    %c0_i32_0 = arith.constant 0 : i32
    %c0_i32_1 = arith.constant 0 : i32
    return %c0_i32, %c0_i32_0 : i32, i32
  }
  func.func @transform_5(%arg0: i32) -> (i32, i32) {
    %c0_i32 = arith.constant 0 : i32
    %c0_i32_0 = arith.constant 0 : i32
    %c0_i32_1 = arith.constant 0 : i32
    return %c0_i32, %c0_i32_0 : i32, i32
  }
  func.func @transform_6(%arg0: i32) -> (i32, i32) {
    %c0_i32 = arith.constant 0 : i32
    %c0_i32_0 = arith.constant 0 : i32
    %c0_i32_1 = arith.constant 0 : i32
    return %c0_i32, %c0_i32_0 : i32, i32
  }
  func.func @transform_7(%arg0: i32) -> (i32, i32) {
    %c0_i32 = arith.constant 0 : i32
    %c0_i32_0 = arith.constant 0 : i32
    %c0_i32_1 = arith.constant 0 : i32
    return %c0_i32, %c0_i32_0 : i32, i32
  }
  func.func @transform_8(%arg0: i32) -> (i32, i32) {
    %c0_i32 = arith.constant 0 : i32
    %c0_i32_0 = arith.constant 0 : i32
    %c0_i32_1 = arith.constant 0 : i32
    return %c0_i32, %c0_i32_0 : i32, i32
  }
  func.func @transform_9(%arg0: i32) -> (i32, i32, i32) {
    %c0_i32 = arith.constant 0 : i32
    %c0_i32_0 = arith.constant 0 : i32
    %c0_i32_1 = arith.constant 0 : i32
    return %arg0, %c0_i32, %c0_i32_0 : i32, i32, i32
  }
}

</mosaic_0001>

<bundles_post_ra>
// kernel: tpu_custom_call.1
= control target key start
LH: loop header
LB: loop body
LE: loop exit
PB: predicated region body
PF: predicated region fallthrough
CT: control target
= control target key end

     0   :  { %s3473_s0 = inlined_call_operand.hbm [shape: f32[16,8,256], index: 0, kind: input, shape index: {}]   ;;  %s3474_s1 = inlined_call_operand.vmem [shape: s8[16,8,8], index: 1, kind: input, shape index: {}]   ;;  %s3475_s2 = inlined_call_operand.vmem [shape: f32[16,8,8], index: 2, kind: input, shape index: {}]   ;;  %s3476_s3 = inlined_call_operand.hbm [shape: f32[256,256], index: 3, kind: input, shape index: {}]   ;;  %s3477_s4 = inlined_call_operand.vmem [shape: f32[1,256], index: 4, kind: input, shape index: {}]   ;;  %s3478_s5 = inlined_call_operand.hbm [shape: f32[256,256], index: 5, kind: input, shape index: {}]   ;;  %s3479_s6 = inlined_call_operand.vmem [shape: f32[1,256], index: 6, kind: input, shape index: {}]   ;;  %s3480_s7 = inlined_call_operand.hbm [shape: f32[256,128], index: 7, kind: input, shape index: {}]   ;;  %s3481_s8 = inlined_call_operand.vmem [shape: f32[1,128], index: 8, kind: input, shape index: {}]   ;;  %s3482_s9 = inlined_call_operand.hbm [shape: f32[2,8,128], index: 9, kind: output, shape index: {}]  }
   0x1   :  { %3489 = sst [smem:[#allocation15_spill]] %s3476_s3 }
   0x2   :  { %3490 = sst [smem:[#allocation16_spill]] %s3478_s5 }
   0x3   :  { %3491 = sst [smem:[#allocation17_spill]] %s3480_s7 }
   0x4   :  { %14 = vsyncpa [#allocation3], 0 }
   0x5   :  { %16 = vsyncpa [#allocation3 + $0x1], 0 }
   0x6   :  { %17 = vsyncpa [#allocation6], 0 }
   0x7   :  { %18 = vsyncpa [#allocation9], 0 }
   0x8   :  { %19 = vsyncpa [#allocation4], 0 }
   0x9   :  { %21 = vsyncpa [#allocation4 + $0x1], 0  ;;  %s2961_s30 = smov 0   ;;  %s2963_s10 = smov 0  }
   0xa   :  { %s2965_s11 = smov 0   ;;  %s2967_s12 = smov 0  }
   0xb LB: > { %s2982_s13 = sadd.s32 4294967295, %s2899_s12   ;;  %s2508_s14 = sadd.s32 4294967294, %s2899_s12   ;;  %s2899_s12 = sphi %s2967_s12, %s3515_s12   ;;  %s2895_s11 = sphi %s2965_s11, %s3514_s11   ;;  %s2891_s10 = sphi %s2963_s10, %s3513_s10   ;;  %s2887_s30 = sphi %s2961_s30, %s3512_s30  }
   0xc   : > { %p47_p0 = scmp.ne.s32.totalorder %s2891_s10, %s2887_s30  ;;  %p3483_p1 = scmp.eq.s32.totalorder %s2982_s13, 0 }
   0xd   : > { %p249_p2 = scmp.eq.s32.totalorder %s2982_s13, 1  ;;  %p255_p3 = scmp.eq.s32.totalorder %s2508_s14, 1 }
   0xe   : > { %p2991_p4 = por %p3483_p1, %p47_p0  ;;  %p2509_p5 = scmp.ge.s32.totalorder %s2899_s12, 1 }
   0xf   : > { %p2996_p6 = por %p255_p3, %p47_p0  ;;  %p262_p7 = scmp.lt.s32.totalorder %s2899_s12, 3 }
  0x10   : > { %s3492_s15 = scalar_select %p2991_p4, 1, 0 }
  0x11   : > { %s3493_s16 = scalar_select %p2996_p6, 1, 0 }
  0x12   : > { %p3001_p8 = pnand %p2509_p5, %p262_p7  ;;  %s2901_s18 = smov [#allocation5]  }
  0x13   : > { %s274_s19 = sshll.u32 %s2901_s18, 4  ;;  %s2902_s21 = smov [#allocation7]   ;;  %s275_s19 = int_to_ptr.vmem [resolvable:$true] %s274_s19 }
  0x14   : > { %s3494_s17 = scalar_select %p3001_p8, 1, 0 }
  0x15   : > { %p2621_p9 = pneg %p3001_p8  ;;  %s290_s22 = sshll.u32 %s2902_s21, 4  ;;  %s291_s22 = int_to_ptr.vmem [resolvable:$true] %s290_s22 }
  0x16   : > { %s2903_s23 = smov [#allocation8]   ;;  %s2732_s25 = scalar_lea.vmem %s275_s19, 8192 }
  0x17   : > { %p3010_p11 = pnand %p2621_p9, %p3483_p1  ;;  %s306_s24 = sshll.u32 %s2903_s23, 4  ;;  %s307_s24 = int_to_ptr.vmem [resolvable:$true] %s306_s24 }
  0x18   : > { %p2733_p13 = scmp.ne.s32.totalorder %s275_s19, %s2732_s25  ;;  %p2740_p5 = scmp.lt.s32.totalorder %s275_s19, %s275_s19 }
  0x19   : > { %p2723_p12 = pneg %p3010_p11  ;;  %p2741_p7 = scmp.lt.s32.totalorder %s2732_s25, %s2732_s25 }
  0x1b   : > { %p2735_p0 = pnand %p2733_p13, %p2723_p12  ;;  %p2742_p9 = por %p2741_p7, %p2740_p5 }
  0x1d   : > { %p2736_p3 = pneg %p2735_p0 }
  0x1f   : > { %p2743_p10 = pnand %p2742_p9, %p2736_p3 }
  0x21   : > { %2746 = shalt.err (!%p2743_p10)
}
  0x22   : > { %s3484_s26 = smov 256   ;;  %s3485_s27 = smov 16  }
  0x23   : > { %s3496_s3 = sld [smem:[#allocation15_spill]]  ;;  %s2758_s14 = scalar_lea.vmem %s291_s22, 8192 }
  0x24   : > { %p2759_p13 = scmp.ne.s32.totalorder %s291_s22, %s2758_s14  ;;  %p2766_p3 = scmp.lt.s32.totalorder %s291_s22, %s291_s22 }
  0x25   : > { %p2767_p10 = scmp.lt.s32.totalorder %s2758_s14, %s2758_s14 }
  0x26   : > { %p2761_p0 = pnand %p2759_p13, %p2723_p12 }
  0x27   : > { %p2768_p7 = por %p2767_p10, %p2766_p3 }
  0x28   : > { %p2762_p5 = pneg %p2761_p0 }
  0x29   : > { %2624 = dma.hbm_to_vmem [thread:$0]  (!%p3010_p11), %s3496_s3, 8192, %s275_s19, [#allocation6], %s3484_s26, %s3484_s26, %s3485_s27  }
  0x2a   : > { %p2769_p9 = pnand %p2768_p7, %p2762_p5 }
  0x2c   : > { %2772 = shalt.err (!%p2769_p9)
}
  0x2d   : > { %s3497_s5 = sld [smem:[#allocation16_spill]]  ;;  %s2784_s19 = scalar_lea.vmem %s307_s24, 4096 }
  0x2e   : > { %p2785_p1 = scmp.ne.s32.totalorder %s307_s24, %s2784_s19  ;;  %p2792_p3 = scmp.lt.s32.totalorder %s307_s24, %s307_s24 }
  0x2f   : > { %p2793_p5 = scmp.lt.s32.totalorder %s2784_s19, %s2784_s19 }
  0x30   : > { %p2787_p13 = pnand %p2785_p1, %p2723_p12 }
  0x31   : > { %p2794_p10 = por %p2793_p5, %p2792_p3 }
  0x32   : > { %p2788_p0 = pneg %p2787_p13 }
  0x33   : > { %2627 = dma.hbm_to_vmem [thread:$0]  (!%p3010_p11), %s3497_s5, 8192, %s291_s22, [#allocation6], %s3484_s26, %s3484_s26, %s3485_s27  }
  0x34   : > { %p2795_p7 = pnand %p2794_p10, %p2788_p0 }
  0x36   : > { %2798 = shalt.err (!%p2795_p7)
}
  0x37   : > { %s2906_s23 = smov 128   ;;  %s2907_s22 = smov 8  }
  0x38   : > { %s3498_s7 = sld [smem:[#allocation17_spill]]  ;;  %s3047_s29 = sadd.s32 1, %s2899_s12  }
  0x39   : > { %s31_s14 = ssub.s32 %s2899_s12, %s3047_s29  ;;  %s34_s18 = sadd.s32 1, %s2895_s11 }
  0x3a   : > { %p32_p1 = scmp.eq.s32.totalorder %s31_s14, 0  ;;  %p41_p12 = scmp.ne.s32.totalorder %s2895_s11, %s2891_s10 }
  0x3b   : > { %p42_p9 = scmp.eq.s32.totalorder %s2899_s12, 0  ;;  %p2642_p13 = scmp.lt.s32.totalorder %s2899_s12, 2 }
  0x3c   : > { %s3057_s21 = scalar_select %p32_p1, %s2895_s11, %s34_s18  }
  0x3d   : > { %p43_p0 = por %p42_p9, %p41_p12  ;;  %p3061_p3 = por %p249_p2, %p41_p12 }
  0x3e   : > { %2630 = dma.hbm_to_vmem [thread:$0]  (!%p3010_p11), %s3498_s7, 4096, %s307_s24, [#allocation9], %s2906_s23, %s2906_s23, %s2907_s22  }
  0x3f   : > { %s3499_s19 = scalar_select %p3061_p3, 1, 0 }
  0x40   : > { %s323_s20 = sand.u32 1, %s2895_s11   ;;  %s2550_s25 = sshll.u32 %s2899_s12, 11 }
  0x41   : > { %s2514_s24 = sshll.u32 %s323_s20, 7  ;;  %s3070_s28 = scalar_lea.hbm %s3473_s0, %s2550_s25 }
  0x42   : > { %s327_s14 = scalar_lea.vmem [#allocation2], %s2514_s24  ;;  %p3072_p11 = pnand %p2642_p13, %p43_p0 }
  0x43   : > { %s335_s18 = sshll.u32 %s327_s14, 4  ;;  %s3078_s27 = scalar_lea.sflag [#allocation3], %s323_s20  ;;  %s3076_s18 = int_to_ptr.vmem [resolvable:$true] %s335_s18 }
  0x44   : > { %s2799_s3 = scalar_lea.hbm %s3070_s28, 2048  ;;  %p2801_p5 = pneg %p3072_p11 }
  0x45   : > { %p2800_p2 = scmp.ne.s32.totalorder %s3070_s28, %s2799_s3  ;;  %s2804_s24 = scalar_lea.hbm %s3473_s0, 4096 }
  0x46   : > { %p2805_p1 = scmp.lt.s32.totalorder %s3070_s28, %s3473_s0  ;;  %p2806_p12 = scmp.lt.s32.totalorder %s2804_s24, %s2799_s3 }
  0x47   : > { %p2802_p10 = pnand %p2801_p5, %p2800_p2 }
  0x48   : > { %p2807_p9 = por %p2806_p12, %p2805_p1 }
  0x49   : > { %p2803_p7 = pneg %p2802_p10 }
  0x4b   : > { %p2808_p13 = pnand %p2807_p9, %p2803_p7 }
  0x4d   : > { %2811 = shalt.err (!%p2808_p13)
}
  0x4e   : > { %s2812_s20 = scalar_lea.vmem %s3076_s18, 2048  ;;  %s2908_s5 = smov [#allocation2]  }
  0x4f   : > { %p2813_p0 = scmp.ne.s32.totalorder %s3076_s18, %s2812_s20  ;;  %s2817_s7 = sshll.u32 %s2908_s5, 4  ;;  %s2818_s7 = int_to_ptr.vmem [resolvable:$false] %s2817_s7 }
  0x50   : > { %s2819_s25 = scalar_lea.vmem %s2818_s7, 4096  ;;  %p2820_p10 = scmp.lt.s32.totalorder %s3076_s18, %s2818_s7 }
  0x51   : > { %p2815_p6 = pnand %p2813_p0, %p2801_p5  ;;  %p2821_p3 = scmp.lt.s32.totalorder %s2819_s25, %s2812_s20 }
  0x53   : > { %p2816_p2 = pneg %p2815_p6  ;;  %p2822_p4 = por %p2821_p3, %p2820_p10 }
  0x55   : > { %p2823_p8 = pnand %p2822_p4, %p2816_p2 }
  0x57   : > { %2826 = shalt.err (!%p2823_p8)
}
  0x58   : > { %s3501_s3 = smov 16   ;;  %s3502_s23 = smov 256  }
  0x59   : > { %2634 = dma.hbm_to_vmem [thread:$0]  (!%p3072_p11), %s3070_s28, 2048, %s3076_s18, %s3078_s27, %s3502_s23, %s3502_s23, %s3501_s3  }
  0x5a   : > { %p3503_p6 = scmp.ne.s32.totalorder %s3494_s17, 0 }
  0x5b   : > { %s3105_s5 = sand.u32 (!%p3503_p6), 1, %s2891_s10   ;;  %p3504_p4 = scmp.ne.s32.totalorder (!%p3503_p6), %s3492_s15, 0 }
  0x5c   : > { %365 = sbr.rel (%p3503_p6) target bundleno = 1196 (0x4ac), region = 56  ;;  %s2519_s7 = sshll.u32 (!%p3503_p6), %s3105_s5, 7 }
  0x5d   : > { %s368_s24 = scalar_lea.sflag (!%p3503_p6), [#allocation3], %s3105_s5  ;;  %s3109_s22 = scalar_lea.vmem (!%p3503_p6), [#allocation2], %s2519_s7 }
  0x61   : > { %2870 = dma.done.wait (%p3504_p4), %s368_s24, 2048  }
  0x62   : > { %2872 = vsyncadd (%p3504_p4), %s368_s24, 4294965248  ;;  %p3505_p8 = scmp.eq.s32.totalorder %s2982_s13, 0 }
  0x64   : > { %2874 = dma.done.wait (%p3505_p8), [#allocation6], 16384   ;;  %p3506_p3 = pmov %p3505_p8 }
  0x66   : > { %2876 = vsyncadd (%p3506_p3), [#allocation6], 4294950912  ;;  %p3507_p11 = pmov %p3506_p3 }
  0x67   : > { %p3508_p5 = pmov %p3506_p3 }
  0x68   : > { %2878 = dma.done.wait (%p3507_p11), [#allocation9], 4096  }
  0x69   : > { %2880 = vsyncadd (%p3508_p5), [#allocation9], 4294963200  ;;  %s2524_s17 = sshll.u32 %s2982_s13, 3  ;;  %v2909_v0 = vmov 0.0   ;;  %v3132_v1 = vld [vmem:[%s3109_s22 + $0x8] sm:$0xff]  ;;  %v3135_v2 = vld [vmem:[%s3109_s22] sm:$0xff] }
  0x6a   : > { %589 = vmatprep.mubr.f32.mxu0 %v2909_v0  ;;  %p430_p7 = scmp.lt.s32.totalorder %s2524_s17, 15  ;;  %1107 = vmatprep.mubr.f32.mxu1 %v2909_v0  ;;  %v3140_v4 = vld [vmem:[%s3109_s22 + $0x18] sm:$0xff]  ;;  %v3158_v17 = vld [vmem:[%s3109_s22 + $0x70] sm:$0xff]  ;;  %vm521_vm0 = vcmask 64512   ;;  %v3172_v41 = vld [vmem:[%s3109_s22 + $0x28] sm:$0xff]  ;;  %vm2276_vm1 = vcmask 1041409  }
  0x6b   : > { %555 = vmatprep.subr.mxu0 %v3132_v1  ;;  %v3154_v16 = vld [vmem:[%s3109_s22 + $0x78] sm:$0xff]  ;;  %v3169_v39 = vld [vmem:[%s3109_s22 + $0x10] sm:$0xff]  ;;  %v3182_v47 = vld [vmem:[%s3109_s22 + $0x20] sm:$0xff]  ;;  %vm2278_vm2 = vcmask 1042434   ;;  %vm2280_vm3 = vcmask 1043459   ;;  %vm2282_vm4 = vcmask 1044484  }
  0x6c   : > { %s3517_s17 = smov (!%p430_p7, %s2524_s17), 15  ;;  %556 = vmatpush1.msra.mxu0 %v3135_v2  ;;  %1073 = vmatprep.subr.mxu1 %v3154_v16  ;;  %v3185_v49 = vld [vmem:[%s3109_s22 + $0x38] sm:$0xff]  ;;  %v3195_v55 = vld [vmem:[%s3109_s22 + $0x30] sm:$0xff]  ;;  %v3200_v57 = vld [vmem:[%s3109_s22 + $0x48] sm:$0xff]  ;;  %vm2284_vm5 = vcmask 1045509   ;;  %vm2286_vm6 = vcmask 1046534  }
  0x6d   : > { %s2527_s15 = sshll.u32 %s3517_s17, 3  ;;  %s2525_s18 = sshll.u32 %s3517_s17, 1  ;;  %629 = vmatprep.subr.mxu0 %v3140_v4  ;;  %1074 = vmatpush1.msra.mxu1 %v3158_v17  ;;  %v3212_v62 = vld [vmem:[%s3109_s22 + $0x40] sm:$0xff]  ;;  %v3216_v63 = vld [vmem:[%s3109_s22 + $0x58] sm:$0xff]  ;;  %vm2288_vm7 = vcmask 1047559  }
  0x6e   : > { %s3129_s28 = scalar_lea.vmem %s3475_s2, %s2527_s15  ;;  %s3150_s25 = scalar_lea.vmem %s3474_s1, %s2525_s18 }
  0x6f   : > { %v481_v3 = vld [vmem:[%s3129_s28] sm:$0xff]  ;;  %v482_v6 = vld [vmem:[%s3129_s28 + $0x8] sm:$0xff]  ;;  %v483_v8 = vld [vmem:[%s3129_s28 + $0x10] sm:$0xff]  ;;  %s2523_s15 = sshll.u32 %s3105_s5, 3  ;;  %s2546_s26 = sshll.u32 %s2982_s13, 7 }
  0x70   : > { %v489_v5 = vmul.f32 %v481_v3, %v481_v3  ;;  %v490_v7 = vmul.f32 %v482_v6, %v482_v6  ;;  %v491_v10 = vmul.f32 %v483_v8, %v483_v8  ;;  %v484_v11 = vld [vmem:[%s3129_s28 + $0x18] sm:$0xff]  ;;  %v485_v15 = vld [vmem:[%s3129_s28 + $0x20] sm:$0xff]  ;;  %v486_v23 = vld [vmem:[%s3129_s28 + $0x28] sm:$0xff]  ;;  %s427_s27 = scalar_lea.vmem [#allocation10], %s2523_s15  ;;  %s3436_s20 = scalar_lea.hbm %s3482_s9, %s2546_s26 }
  0x71   : > { %v492_v13 = vmul.f32 %v484_v11, %v484_v11  ;;  %v488_v18 = vld [vmem:[%s3129_s28 + $0x38] sm:$0xff]  ;;  %v2552_v19 = vld [vmem:[%s3150_s25] sm:$0xff]   ;;  %v493_v21 = vmul.f32 %v485_v15, %v485_v15  ;;  %v494_v28 = vmul.f32 %v486_v23, %v486_v23  ;;  %v487_v29 = vld [vmem:[%s3129_s28 + $0x30] sm:$0xff]  ;;  %s2385_s28 = sshll.u32 %s427_s27, 4  ;;  %p3509_p12 = scmp.ne.s32.totalorder %s3499_s19, 0  ;;  %s2386_s28 = int_to_ptr.vmem [resolvable:$true] %s2385_s28 }
  0x72   : > { %v497_v9 = vadd.f32 1e-06, %v489_v5  ;;  %v498_v12 = vadd.f32 1e-06, %v490_v7  ;;  %v499_v14 = vadd.f32 1e-06, %v491_v10  ;;  %v496_v22 = vmul.f32 %v488_v18, %v488_v18 }
  0x73   : > { %v500_v20 = vadd.f32 1e-06, %v492_v13  ;;  %v2553_v24 = vunpack.c.0.s8 %v2552_v19  ;;  %v2554_v26 = vunpack.c.1.s8 %v2552_v19  ;;  %v501_v27 = vadd.f32 1e-06, %v493_v21  ;;  %v2603_v36 = vld [vmem:[%s3150_s25 + $0x8] sm:$0xff]   ;;  %v3226_v8 = vld [vmem:[%s3109_s22 + $0x50] sm:$0xff] }
  0x74   : > { %2687 = vrcp.f32 %v497_v9  ;;  %v504_v25 = vadd.f32 1e-06, %v496_v22  ;;  %v2557_v31 = vunpack.c.2.s8 %v2552_v19  ;;  %v502_v33 = vadd.f32 1e-06, %v494_v28  ;;  %v3229_v9 = vld [vmem:[%s3109_s22 + $0x68] sm:$0xff]  ;;  %v3239_v13 = vld [vmem:[%s3109_s22 + $0x60] sm:$0xff] }
  0x75   : > { %2689 = vrcp.f32 %v498_v12  ;;  %v473_v30 = vcvt.s32.f32 %v2553_v24  ;;  %v474_v32 = vcvt.s32.f32 %v2554_v26  ;;  %v495_v34 = vmul.f32 %v487_v29, %v487_v29  ;;  %v1160_v18 = vld [vmem:[#allocation5 + $0xf0] sm:$0xff]  ;;  %v1157_v21 = vld [vmem:[#allocation5 + $0xd8] sm:$0xff]  ;;  %v1155_v23 = vld [vmem:[#allocation5 + $0xc8] sm:$0xff]  ;;  %s2372_s25 = scalar_lea.sflag [#allocation4], %s3105_s5  ;;  %s2827_s3 = scalar_lea.vmem %s2386_s28, 128 }
  0x76   : > { %2691 = vrcp.f32 %v499_v14  ;;  %v2566_v40 = vunpack.c.3.s8 %v2603_v36  ;;  %v2558_v42 = vunpack.c.3.s8 %v2552_v19  ;;  %v475_v44 = vcvt.s32.f32 %v2557_v31  ;;  %v1161_v14 = vld [vmem:[#allocation5 + $0xf8] sm:$0xff]  ;;  %v1159_v19 = vld [vmem:[#allocation5 + $0xe8] sm:$0xff]  ;;  %v1156_v22 = vld [vmem:[#allocation5 + $0xd0] sm:$0xff]  ;;  %p2828_p1 = scmp.ne.s32.totalorder %s2386_s28, %s2827_s3  ;;  %s2910_s23 = smov [#allocation10]  }
  0x77   : > { %2693 = vrcp.f32 %v500_v20  ;;  %v503_v45 = vadd.f32 1e-06, %v495_v34  ;;  %v2561_v53 = vunpack.c.0.s8 %v2603_v36  ;;  %v2562_v60 = vunpack.c.1.s8 %v2603_v36  ;;  %v1158_v20 = vld [vmem:[#allocation5 + $0xe0] sm:$0xff]  ;;  %v1152_v26 = vld [vmem:[#allocation5 + $0xb0] sm:$0xff]  ;;  %v1149_v29 = vld [vmem:[#allocation5 + $0x98] sm:$0xff]  ;;  %s2831_s7 = sshll.u32 %s2910_s23, 4  ;;  %s2832_s7 = int_to_ptr.vmem [resolvable:$false] %s2831_s7 }
  0x78   : > { %2695 = vrcp.f32 %v504_v25  ;;  %v480_v48 = vcvt.s32.f32 %v2566_v40  ;;  %v476_v52 = vcvt.s32.f32 %v2558_v42  ;;  %v2565_v6 = vunpack.c.2.s8 %v2603_v36  ;;  %v1154_v24 = vld [vmem:[#allocation5 + $0xc0] sm:$0xff]  ;;  %v1153_v25 = vld [vmem:[#allocation5 + $0xb8] sm:$0xff]  ;;  %v1147_v31 = vld [vmem:[#allocation5 + $0x88] sm:$0xff]  ;;  %p2829_p9 = pnand %p2828_p1, %p3509_p12  ;;  %s2833_s13 = scalar_lea.vmem %s2832_s7, 256 }
  0x79   : > { %2697 = vrcp.f32 %v501_v27  ;;  %v477_v59 = vcvt.s32.f32 %v2561_v53  ;;  %v478_v5 = vcvt.s32.f32 %v2562_v60  ;;  %v1151_v27 = vld [vmem:[#allocation5 + $0xa8] sm:$0xff]  ;;  %v1150_v28 = vld [vmem:[#allocation5 + $0xa0] sm:$0xff]  ;;  %v1144_v34 = vld [vmem:[#allocation5 + $0x70] sm:$0xff]  ;;  %p2834_p0 = scmp.lt.s32.totalorder %s2386_s28, %s2832_s7  ;;  %p2835_p2 = scmp.lt.s32.totalorder %s2833_s13, %s2827_s3 }
  0x7a   : > { %2699 = vrcp.f32 %v502_v33  ;;  %v479_v11 = vcvt.s32.f32 %v2565_v6  ;;  %v1145_v33 = vld [vmem:[#allocation5 + $0x78] sm:$0xff]  ;;  %v1142_v36 = vld [vmem:[#allocation5 + $0x60] sm:$0xff]  ;;  %v1140_v40 = vld [vmem:[#allocation5 + $0x50] sm:$0xff]  ;;  %p2830_p13 = pneg %p2829_p9 }
  0x7b   : > { %2701 = vrcp.f32 %v503_v45  ;;  %v1139_v42 = vld [vmem:[#allocation5 + $0x48] sm:$0xff]  ;;  %v1137_v45 = vld [vmem:[#allocation5 + $0x38] sm:$0xff]  ;;  %v1132_v53 = vld [vmem:[#allocation5 + $0x10] sm:$0xff]  ;;  %p2836_p10 = por %p2835_p2, %p2834_p0 }
  0x7c   : > { %v1193_v60 = vld [vmem:[#allocation5 + $0x1f8] sm:$0xff]  ;;  %v1190_v6 = vld [vmem:[#allocation5 + $0x1e0] sm:$0xff] }
  0x7d   : > { %p2837_p6 = pnand %p2836_p10, %p2830_p13 }
  0x81   : > { %v2688_v35 = vpop.eup %2687 }
  0x82   : > { %v2690_v37 = vpop.eup %2689  ;;  %v3166_v38 = vmul.f32 %v2688_v35, %v473_v30  ;;  %v1148_v30 = vld [vmem:[#allocation5 + $0x90] sm:$0xff]  ;;  %v1143_v35 = vld [vmem:[#allocation5 + $0x68] sm:$0xff] }
  0x83   : > { %v3176_v43 = vmul.f32 %v2690_v37, %v474_v32  ;;  %v2692_v46 = vpop.eup %2691  ;;  %v1146_v32 = vld [vmem:[#allocation5 + $0x80] sm:$0xff]  ;;  %v1141_v37 = vld [vmem:[#allocation5 + $0x58] sm:$0xff] }
  0x84   : > { %2528 = vmatmul.mubr.msk.f32.vlgmr.msra.gmra.mxu0 %vm521_vm0, %v3166_v38  ;;  %v2694_v50 = vpop.eup %2693  ;;  %v3189_v51 = vmul.f32 %v2692_v46, %v475_v44  ;;  %v1138_v44 = vld [vmem:[#allocation5 + $0x40] sm:$0xff]  ;;  %v1136_v46 = vld [vmem:[#allocation5 + $0x30] sm:$0xff] }
  0x85   : > { %630 = vmatpush1.msra.mxu0 %v3169_v39  ;;  %663 = vmatprep.mubr.f32.mxu0 %v2909_v0  ;;  %v2696_v54 = vpop.eup %2695  ;;  %v3204_v58 = vmul.f32 %v2694_v50, %v476_v52  ;;  %v1134_v50 = vld [vmem:[#allocation5 + $0x20] sm:$0xff]  ;;  %v1133_v52 = vld [vmem:[#allocation5 + $0x18] sm:$0xff] }
  0x86   : > { %703 = vmatprep.subr.mxu0 %v3172_v41  ;;  %v3197_v56 = vmul.f32 %v2696_v54, %v480_v48  ;;  %v2698_v61 = vpop.eup %2697  ;;  %v1135_v48 = vld [vmem:[#allocation5 + $0x28] sm:$0xff] }
  0x87   : > { %v3220_v3 = vmul.f32 %v2698_v61, %v477_v59  ;;  %v2700_v7 = vpop.eup %2699  ;;  %v1131_v54 = vld [vmem:[#allocation5 + $0x8] sm:$0xff]  ;;  %v1130_v59 = vld [vmem:[#allocation5] sm:$0xff]  ;;  %v1192_v61 = vld [vmem:[#allocation5 + $0x1f0] sm:$0xff] }
  0x88   : > { %2529 = vmatmul.mubr.msk.f32.vlgmr.msra.gmra.mxu0 %vm521_vm0, %v3176_v43  ;;  %2535 = vmatmul.mubr.msk.f32.vlgmr.msra.gmra.mxu1 %vm521_vm0, %v3197_v56  ;;  %v3233_v10 = vmul.f32 %v2700_v7, %v478_v5  ;;  %v2702_v12 = vpop.eup %2701  ;;  %v1191_v5 = vld [vmem:[#allocation5 + $0x1e8] sm:$0xff]  ;;  %v1189_v7 = vld [vmem:[#allocation5 + $0x1d8] sm:$0xff] }
  0x89   : > { %704 = vmatpush1.msra.mxu0 %v3182_v47  ;;  %737 = vmatprep.mubr.f32.mxu0 %v2909_v0  ;;  %v3243_v15 = vmul.f32 %v2702_v12, %v479_v11  ;;  %v1188_v11 = vld [vmem:[#allocation5 + $0x1d0] sm:$0xff]  ;;  %v1187_v12 = vld [vmem:[#allocation5 + $0x1c8] sm:$0xff] }
  0x8a   : > { %777 = vmatprep.subr.mxu0 %v3185_v49  ;;  %1383 = vmatprep.mubr.f32.mxu1 %v2909_v0 }
  0x8c   : > { %2530 = vmatmul.mubr.msk.f32.vlgmr.msra.gmra.mxu0 %vm521_vm0, %v3189_v51 }
  0x8d   : > { %778 = vmatpush1.msra.mxu0 %v3195_v55  ;;  %811 = vmatprep.mubr.f32.mxu0 %v2909_v0 }
  0x8e   : > { %851 = vmatprep.subr.mxu0 %v3200_v57 }
  0x90   : > { %2531 = vmatmul.mubr.msk.f32.vlgmr.msra.gmra.mxu0 %vm521_vm0, %v3204_v58 }
  0x91   : > { %852 = vmatpush1.msra.mxu0 %v3212_v62  ;;  %885 = vmatprep.mubr.f32.mxu0 %v2909_v0 }
  0x92   : > { %925 = vmatprep.subr.mxu0 %v3216_v63 }
  0x94   : > { %2532 = vmatmul.mubr.msk.f32.vlgmr.msra.gmra.mxu0 %vm521_vm0, %v3220_v3 }
  0x95   : > { %926 = vmatpush1.msra.mxu0 %v3226_v8  ;;  %959 = vmatprep.mubr.f32.mxu0 %v2909_v0 }
  0x96   : > { %999 = vmatprep.subr.mxu0 %v3229_v9 }
  0x98   : > { %2533 = vmatmul.mubr.msk.f32.vlgmr.msra.gmra.mxu0 %vm521_vm0, %v3233_v10 }
  0x99   : > { %1000 = vmatpush1.msra.mxu0 %v3239_v13  ;;  %1033 = vmatprep.mubr.f32.mxu0 %v2909_v0 }
  0x9a   : > { %1206 = vmatprep.subr.mxu0 %v1161_v14  ;;  %v1186_v14 = vld [vmem:[#allocation5 + $0x1c0] sm:$0xff] }
  0x9c   : > { %2534 = vmatmul.mubr.msk.f32.vlgmr.msra.gmra.mxu0 %vm521_vm0, %v3243_v15 }
  0x9d   : > { %1207 = vmatpush1.msra.mxu0 %v1160_v18  ;;  %v1185_v18 = vld [vmem:[#allocation5 + $0x1b8] sm:$0xff] }
  0x9e   : > { %1208 = vmatprep.subr.mxu0 %v1159_v19  ;;  %v1184_v19 = vld [vmem:[#allocation5 + $0x1b0] sm:$0xff] }
  0x9f   : > { %1209 = vmatpush1.msra.mxu0 %v1158_v20  ;;  %v1183_v20 = vld [vmem:[#allocation5 + $0x1a8] sm:$0xff] }
  0xa0   : > { %1210 = vmatprep.subr.mxu0 %v1157_v21  ;;  %v1182_v21 = vld [vmem:[#allocation5 + $0x1a0] sm:$0xff] }
  0xa1   : > { %1211 = vmatpush1.msra.mxu0 %v1156_v22  ;;  %v1181_v22 = vld [vmem:[#allocation5 + $0x198] sm:$0xff] }
  0xa2   : > { %1212 = vmatprep.subr.mxu0 %v1155_v23  ;;  %v1180_v23 = vld [vmem:[#allocation5 + $0x190] sm:$0xff] }
  0xa3   : > { %1213 = vmatpush1.msra.mxu0 %v1154_v24  ;;  %v1179_v24 = vld [vmem:[#allocation5 + $0x188] sm:$0xff] }
  0xa4   : > { %1214 = vmatprep.subr.mxu0 %v1153_v25  ;;  %v1178_v25 = vld [vmem:[#allocation5 + $0x180] sm:$0xff] }
  0xa5   : > { %1215 = vmatpush1.msra.mxu0 %v1152_v26  ;;  %v1177_v26 = vld [vmem:[#allocation5 + $0x178] sm:$0xff] }
  0xa6   : > { %1216 = vmatprep.subr.mxu0 %v1151_v27  ;;  %v1176_v27 = vld [vmem:[#allocation5 + $0x170] sm:$0xff] }
  0xa7   : > { %1217 = vmatpush1.msra.mxu0 %v1150_v28  ;;  %v1175_v28 = vld [vmem:[#allocation5 + $0x168] sm:$0xff] }
  0xa8   : > { %1218 = vmatprep.subr.mxu0 %v1149_v29  ;;  %v1174_v29 = vld [vmem:[#allocation5 + $0x160] sm:$0xff] }
  0xa9   : > { %1219 = vmatpush1.msra.mxu0 %v1148_v30  ;;  %v1173_v30 = vld [vmem:[#allocation5 + $0x158] sm:$0xff] }
  0xaa   : > { %1220 = vmatprep.subr.mxu0 %v1147_v31  ;;  %v1172_v31 = vld [vmem:[#allocation5 + $0x150] sm:$0xff] }
  0xab   : > { %1221 = vmatpush1.msra.mxu0 %v1146_v32  ;;  %v1171_v32 = vld [vmem:[#allocation5 + $0x148] sm:$0xff] }
  0xac   : > { %1222 = vmatprep.subr.mxu0 %v1145_v33  ;;  %v1170_v33 = vld [vmem:[#allocation5 + $0x140] sm:$0xff] }
  0xad   : > { %1223 = vmatpush1.msra.mxu0 %v1144_v34  ;;  %v1169_v34 = vld [vmem:[#allocation5 + $0x138] sm:$0xff] }
  0xae   : > { %1224 = vmatprep.subr.mxu0 %v1143_v35  ;;  %v1168_v35 = vld [vmem:[#allocation5 + $0x130] sm:$0xff] }
  0xaf   : > { %1225 = vmatpush1.msra.mxu0 %v1142_v36  ;;  %v1167_v36 = vld [vmem:[#allocation5 + $0x128] sm:$0xff] }
  0xb0   : > { %1226 = vmatprep.subr.mxu0 %v1141_v37  ;;  %v1166_v37 = vld [vmem:[#allocation5 + $0x120] sm:$0xff] }
  0xb1   : > { %1227 = vmatpush1.msra.mxu0 %v1140_v40  ;;  %v1165_v40 = vld [vmem:[#allocation5 + $0x118] sm:$0xff] }
  0xb2   : > { %1228 = vmatprep.subr.mxu0 %v1139_v42  ;;  %v1164_v42 = vld [vmem:[#allocation5 + $0x110] sm:$0xff] }
  0xb3   : > { %1229 = vmatpush1.msra.mxu0 %v1138_v44  ;;  %v1163_v44 = vld [vmem:[#allocation5 + $0x108] sm:$0xff] }
  0xb4   : > { %1230 = vmatprep.subr.mxu0 %v1137_v45  ;;  %v1162_v45 = vld [vmem:[#allocation5 + $0x100] sm:$0xff] }
  0xb5   : > { %1231 = vmatpush1.msra.mxu0 %v1136_v46 }
  0xb6   : > { %1232 = vmatprep.subr.mxu0 %v1135_v48 }
  0xb7   : > { %1233 = vmatpush1.msra.mxu0 %v1134_v50 }
  0xb8   : > { %1234 = vmatprep.subr.mxu0 %v1133_v52 }
  0xb9   : > { %1235 = vmatpush1.msra.mxu0 %v1132_v53 }
  0xba   : > { %1236 = vmatprep.subr.mxu0 %v1131_v54 }
  0xbb   : > { %1237 = vmatpush1.msra.mxu0 %v1130_v59 }
  0xbc   : > { %1238 = vmatprep.subr.mxu0 %v1193_v60 }
  0xbd   : > { %1239 = vmatpush2.msra.mxu0 %v1192_v61 }
  0xbe   : > { %1240 = vmatprep.subr.mxu0 %v1191_v5 }
  0xbf   : > { %1241 = vmatpush2.msra.mxu0 %v1190_v6 }
  0xc0   : > { %1242 = vmatprep.subr.mxu0 %v1189_v7 }
  0xc1   : > { %1243 = vmatpush2.msra.mxu0 %v1188_v11 }
  0xc2   : > { %1244 = vmatprep.subr.mxu0 %v1187_v12 }
  0xc3   : > { %1245 = vmatpush2.msra.mxu0 %v1186_v14 }
  0xc4   : > { %1246 = vmatprep.subr.mxu0 %v1185_v18 }
  0xc5   : > { %1247 = vmatpush2.msra.mxu0 %v1184_v19 }
  0xc6   : > { %1248 = vmatprep.subr.mxu0 %v1183_v20 }
  0xc7   : > { %1249 = vmatpush2.msra.mxu0 %v1182_v21 }
  0xc8   : > { %1250 = vmatprep.subr.mxu0 %v1181_v22 }
  0xc9   : > { %1251 = vmatpush2.msra.mxu0 %v1180_v23 }
  0xca   : > { %1252 = vmatprep.subr.mxu0 %v1179_v24 }
  0xcb   : > { %1253 = vmatpush2.msra.mxu0 %v1178_v25 }
  0xcc   : > { %1254 = vmatprep.subr.mxu0 %v1177_v26 }
  0xcd   : > { %1255 = vmatpush2.msra.mxu0 %v1176_v27 }
  0xce   : > { %1256 = vmatprep.subr.mxu0 %v1175_v28 }
  0xcf   : > { %1257 = vmatpush2.msra.mxu0 %v1174_v29 }
  0xd0   : > { %1258 = vmatprep.subr.mxu0 %v1173_v30 }
  0xd1   : > { %1259 = vmatpush2.msra.mxu0 %v1172_v31 }
  0xd2   : > { %1260 = vmatprep.subr.mxu0 %v1171_v32 }
  0xd3   : > { %1261 = vmatpush2.msra.mxu0 %v1170_v33 }
  0xd4   : > { %1262 = vmatprep.subr.mxu0 %v1169_v34 }
  0xd5   : > { %1263 = vmatpush2.msra.mxu0 %v1168_v35 }
  0xd6   : > { %1264 = vmatprep.subr.mxu0 %v1167_v36 }
  0xd7   : > { %1265 = vmatpush2.msra.mxu0 %v1166_v37 }
  0xd8   : > { %1266 = vmatprep.subr.mxu0 %v1165_v40 }
  0xd9   : > { %1267 = vmatpush2.msra.mxu0 %v1164_v42 }
  0xda   : > { %1268 = vmatprep.subr.mxu0 %v1163_v44 }
  0xdb   : > { %1269 = vmatpush2.msra.mxu0 %v1162_v45 }
 0x144   : > { %v591_v46 = vpop.f32.mrf.mxu0 }
 0x145   : > { %v1114_v52 = vadd.f32 %v591_v46, %v3135_v2 }
 0x146   : > { %v593_v48 = vpop.f32.mrf.mxu0 }
 0x147   : > { %v1115_v50 = vadd.f32 %v593_v48, %v3132_v1 }
 0x148   : > { %v665_v53 = vpop.f32.mrf.mxu0 }
 0x149   : > { %1270 = vmatprep.mubr.f32.mxu0 %v1115_v50  ;;  %v1116_v60 = vadd.f32 %v665_v53, %v3169_v39 }
 0x14a   : > { %v667_v54 = vpop.f32.mrf.mxu0  ;;  %1271 = vmatmul.mubr.f32.vlgmr.msra.gmra.mxu0 %v1114_v52 }
 0x14b   : > { %v1117_v59 = vadd.f32 %v667_v54, %v3140_v4 }
 0x14c   : > { %v739_v61 = vpop.f32.mrf.mxu0 }
 0x14d   : > { %1276 = vmatprep.mubr.f32.mxu0 %v1117_v59  ;;  %v1118_v7 = vadd.f32 %v739_v61, %v3182_v47 }
 0x14e   : > { %v741_v5 = vpop.f32.mrf.mxu0  ;;  %1277 = vmatmul.mubr.f32.gmra.mxu0 %v1116_v60 }
 0x14f   : > { %v1119_v6 = vadd.f32 %v741_v5, %v3172_v41  ;;  %v1109_v41 = vpop.f32.mrf.mxu1 }
 0x150   : > { %v813_v11 = vpop.f32.mrf.mxu0  ;;  %v1128_v24 = vadd.f32 %v1109_v41, %v3158_v17  ;;  %v1920_v41 = vld [vmem:[#allocation7 + $0x88] sm:$0xff] }
 0x151   : > { %1282 = vmatprep.mubr.f32.mxu0 %v1119_v6  ;;  %v1120_v12 = vadd.f32 %v813_v11, %v3195_v55  ;;  %v1111_v22 = vpop.f32.mrf.mxu1  ;;  %v1932_v11 = vld [vmem:[#allocation7 + $0xe8] sm:$0xff] }
 0x152   : > { %v815_v1 = vpop.f32.mrf.mxu0  ;;  %1283 = vmatmul.mubr.f32.gmra.mxu0 %v1118_v7  ;;  %v1933_v7 = vld [vmem:[#allocation7 + $0xf0] sm:$0xff] }
 0x153   : > { %v1121_v2 = vadd.f32 %v815_v1, %v3185_v49  ;;  %v1931_v1 = vld [vmem:[#allocation7 + $0xe0] sm:$0xff] }
 0x154   : > { %v887_v14 = vpop.f32.mrf.mxu0 }
 0x155   : > { %1288 = vmatprep.mubr.f32.mxu0 %v1121_v2  ;;  %v1122_v18 = vadd.f32 %v887_v14, %v3212_v62  ;;  %v1930_v2 = vld [vmem:[#allocation7 + $0xd8] sm:$0xff] }
 0x156   : > { %v889_v4 = vpop.f32.mrf.mxu0  ;;  %1289 = vmatmul.mubr.f32.gmra.mxu0 %v1120_v12  ;;  %v1928_v12 = vld [vmem:[#allocation7 + $0xc8] sm:$0xff]  ;;  %v1926_v14 = vld [vmem:[#allocation7 + $0xb8] sm:$0xff] }
 0x157   : > { %v1123_v39 = vadd.f32 %v889_v4, %v3200_v57  ;;  %v1129_v57 = vadd.f32 %v1111_v22, %v3154_v16  ;;  %v1925_v4 = vld [vmem:[#allocation7 + $0xb0] sm:$0xff]  ;;  %v1915_v22 = vld [vmem:[#allocation7 + $0x60] sm:$0xff] }
 0x158   : > { %v961_v19 = vpop.f32.mrf.mxu0 }
 0x159   : > { %1294 = vmatprep.mubr.f32.mxu0 %v1123_v39  ;;  %v1124_v21 = vadd.f32 %v961_v19, %v3226_v8  ;;  %v1924_v39 = vld [vmem:[#allocation7 + $0xa8] sm:$0xff]  ;;  %v1921_v19 = vld [vmem:[#allocation7 + $0x90] sm:$0xff] }
 0x15a   : > { %v963_v47 = vpop.f32.mrf.mxu0  ;;  %1295 = vmatmul.mubr.f32.gmra.mxu0 %v1122_v18  ;;  %v1923_v18 = vld [vmem:[#allocation7 + $0xa0] sm:$0xff] }
 0x15b   : > { %v1125_v20 = vadd.f32 %v963_v47, %v3216_v63  ;;  %v1196_v63 = vlaneseq  ;;  %v1919_v47 = vld [vmem:[#allocation7 + $0x80] sm:$0xff] }
 0x15c   : > { %v1035_v49 = vpop.f32.mrf.mxu0 }
 0x15d   : > { %1300 = vmatprep.mubr.f32.mxu0 %v1125_v20  ;;  %v1126_v62 = vadd.f32 %v1035_v49, %v3239_v13  ;;  %v3265_v25 = vshrl.u32 %v1196_v63, 7  ;;  %v1918_v20 = vld [vmem:[#allocation7 + $0x78] sm:$0xff]  ;;  %v1916_v49 = vld [vmem:[#allocation7 + $0x68] sm:$0xff]  ;;  %v1909_v63 = vld [vmem:[#allocation7 + $0x30] sm:$0xff] }
 0x15e   : > { %v1037_v55 = vpop.f32.mrf.mxu0  ;;  %1301 = vmatmul.mubr.f32.gmra.mxu0 %v1124_v21  ;;  %v1917_v21 = vld [vmem:[#allocation7 + $0x70] sm:$0xff] }
 0x15f   : > { %v1127_v23 = vadd.f32 %v1037_v55, %v3229_v9  ;;  %v1202_v8 = vsub.s32 1, %v3265_v25  ;;  %v1198_v26 = vsub.s32 0, %v3265_v25  ;;  %v1194_v9 = vld [vmem:[%s3477_s4] sm:$0x3]  ;;  %v1914_v55 = vld [vmem:[#allocation7 + $0x58] sm:$0xff] }
 0x161   : > { %1306 = vmatprep.mubr.f32.mxu0 %v1127_v23  ;;  %v1203_v16 = vrot.slane %v1194_v9, %v1202_v8  ;;  %v1199_v13 = vrot.slane %v1194_v9, %v1198_v26  ;;  %v1913_v23 = vld [vmem:[#allocation7 + $0x50] sm:$0xff]  ;;  %v1908_v9 = vld [vmem:[#allocation7 + $0x28] sm:$0xff] }
 0x162   : > { %1307 = vmatmul.mubr.f32.gmra.mxu0 %v1126_v62  ;;  %v1911_v62 = vld [vmem:[#allocation7 + $0x40] sm:$0xff] }
 0x163   : > { %1312 = vmatprep.mubr.f32.mxu0 %v1129_v57  ;;  %v1912_v57 = vld [vmem:[#allocation7 + $0x48] sm:$0xff] }
 0x166   : > { %1313 = vmatmul.mubr.f32.gmra.mxu0 %v1128_v24  ;;  %v1910_v24 = vld [vmem:[#allocation7 + $0x38] sm:$0xff] }
 0x20a   : > { %v1272_v27 = vpop.f32.mrf.mxu0 }
 0x20b   : > { %v3278_v29 = vadd.f32 %v1272_v27, %v1199_v13  ;;  %v1905_v27 = vld [vmem:[#allocation7 + $0x10] sm:$0xff] }
 0x20c   : > { %v1274_v17 = vpop.f32.mrf.mxu0 }
 0x20d   : > { %v3276_v28 = vadd.f32 %v1274_v17, %v1203_v16  ;;  %v1904_v17 = vld [vmem:[#allocation7 + $0x8] sm:$0xff] }
 0x20e   : > { %v1278_v30 = vpop.f32.mrf.mxu0 }
 0x20f   : > { %1349 = vmatprep.subr.mxu1 %v3276_v28  ;;  %v3286_v33 = vadd.f32 %v1278_v30, %v1199_v13  ;;  %v1903_v30 = vld [vmem:[#allocation7] sm:$0xff] }
 0x210   : > { %v1280_v31 = vpop.f32.mrf.mxu0  ;;  %1350 = vmatpush1.msra.mxu1 %v3278_v29 }
 0x211   : > { %v3282_v32 = vadd.f32 %v1280_v31, %v1203_v16  ;;  %2536 = vmatmul.mubr.msk.f32.vlgmr.msra.gmra.mxu1 %vm521_vm0, %v3166_v38  ;;  %v1966_v31 = vld [vmem:[#allocation7 + $0x1f8] sm:$0xff] }
 0x212   : > { %v1284_v34 = vpop.f32.mrf.mxu0  ;;  %1454 = vmatprep.mubr.f32.mxu1 %v2909_v0 }
 0x213   : > { %1420 = vmatprep.subr.mxu1 %v3282_v32  ;;  %v3295_v37 = vadd.f32 %v1284_v34, %v1199_v13  ;;  %v1965_v34 = vld [vmem:[#allocation7 + $0x1f0] sm:$0xff] }
 0x214   : > { %v1286_v35 = vpop.f32.mrf.mxu0  ;;  %1421 = vmatpush1.msra.mxu1 %v3286_v33 }
 0x215   : > { %v3291_v36 = vadd.f32 %v1286_v35, %v1203_v16  ;;  %2537 = vmatmul.mubr.msk.f32.vlgmr.msra.gmra.mxu1 %vm521_vm0, %v3176_v43  ;;  %v1964_v35 = vld [vmem:[#allocation7 + $0x1e8] sm:$0xff] }
 0x216   : > { %v1290_v40 = vpop.f32.mrf.mxu0  ;;  %1525 = vmatprep.mubr.f32.mxu1 %v2909_v0 }
 0x217   : > { %1491 = vmatprep.subr.mxu1 %v3291_v36  ;;  %v3304_v44 = vadd.f32 %v1290_v40, %v1199_v13  ;;  %v1963_v40 = vld [vmem:[#allocation7 + $0x1e0] sm:$0xff] }
 0x218   : > { %v1292_v38 = vpop.f32.mrf.mxu0  ;;  %1492 = vmatpush1.msra.mxu1 %v3295_v37 }
 0x219   : > { %v3300_v42 = vadd.f32 %v1292_v38, %v1203_v16  ;;  %2538 = vmatmul.mubr.msk.f32.vlgmr.msra.gmra.mxu1 %vm521_vm0, %v3189_v51  ;;  %v1962_v38 = vld [vmem:[#allocation7 + $0x1d8] sm:$0xff] }
 0x21a   : > { %v1296_v45 = vpop.f32.mrf.mxu0  ;;  %1596 = vmatprep.mubr.f32.mxu1 %v2909_v0 }
 0x21b   : > { %1562 = vmatprep.subr.mxu1 %v3300_v42  ;;  %v3313_v48 = vadd.f32 %v1296_v45, %v1199_v13  ;;  %v1961_v45 = vld [vmem:[#allocation7 + $0x1d0] sm:$0xff] }
 0x21c   : > { %v1298_v43 = vpop.f32.mrf.mxu0  ;;  %1563 = vmatpush1.msra.mxu1 %v3304_v44 }
 0x21d   : > { %v3309_v46 = vadd.f32 %v1298_v43, %v1203_v16  ;;  %2539 = vmatmul.mubr.msk.f32.vlgmr.msra.gmra.mxu1 %vm521_vm0, %v3204_v58  ;;  %v1960_v43 = vld [vmem:[#allocation7 + $0x1c8] sm:$0xff] }
 0x21e   : > { %v1302_v50 = vpop.f32.mrf.mxu0  ;;  %1667 = vmatprep.mubr.f32.mxu1 %v2909_v0 }
 0x21f   : > { %1633 = vmatprep.subr.mxu1 %v3309_v46  ;;  %v3322_v53 = vadd.f32 %v1302_v50, %v1199_v13  ;;  %v1959_v50 = vld [vmem:[#allocation7 + $0x1c0] sm:$0xff] }
 0x220   : > { %v1304_v51 = vpop.f32.mrf.mxu0  ;;  %1634 = vmatpush1.msra.mxu1 %v3313_v48 }
 0x221   : > { %v3318_v52 = vadd.f32 %v1304_v51, %v1203_v16  ;;  %2540 = vmatmul.mubr.msk.f32.vlgmr.msra.gmra.mxu1 %vm521_vm0, %v3220_v3  ;;  %v1958_v51 = vld [vmem:[#allocation7 + $0x1b8] sm:$0xff] }
 0x222   : > { %v1308_v54 = vpop.f32.mrf.mxu0  ;;  %1738 = vmatprep.mubr.f32.mxu1 %v2909_v0 }
 0x223   : > { %1704 = vmatprep.subr.mxu1 %v3318_v52  ;;  %v3331_v60 = vadd.f32 %v1308_v54, %v1199_v13  ;;  %v1957_v54 = vld [vmem:[#allocation7 + $0x1b0] sm:$0xff] }
 0x224   : > { %v1310_v58 = vpop.f32.mrf.mxu0  ;;  %1705 = vmatpush1.msra.mxu1 %v3322_v53 }
 0x225   : > { %v3327_v59 = vadd.f32 %v1310_v58, %v1203_v16  ;;  %2541 = vmatmul.mubr.msk.f32.vlgmr.msra.gmra.mxu1 %vm521_vm0, %v3233_v10  ;;  %v1934_v10 = vld [vmem:[#allocation7 + $0xf8] sm:$0xff]  ;;  %v1956_v58 = vld [vmem:[#allocation7 + $0x1a8] sm:$0xff] }
 0x226   : > { %v1314_v61 = vpop.f32.mrf.mxu0  ;;  %1809 = vmatprep.mubr.f32.mxu1 %v2909_v0 }
 0x227   : > { %1775 = vmatprep.subr.mxu1 %v3327_v59  ;;  %v3340_v6 = vadd.f32 %v1314_v61, %v1199_v13  ;;  %v1906_v13 = vld [vmem:[#allocation7 + $0x18] sm:$0xff]  ;;  %v1955_v61 = vld [vmem:[#allocation7 + $0x1a0] sm:$0xff] }
 0x228   : > { %v1316_v3 = vpop.f32.mrf.mxu0  ;;  %1776 = vmatpush1.msra.mxu1 %v3331_v60 }
 0x229   : > { %v3336_v5 = vadd.f32 %v1316_v3, %v1203_v16  ;;  %2542 = vmatmul.mubr.msk.f32.vlgmr.msra.gmra.mxu1 %vm521_vm0, %v3243_v15  ;;  %v1929_v15 = vld [vmem:[#allocation7 + $0xd0] sm:$0xff]  ;;  %v1907_v16 = vld [vmem:[#allocation7 + $0x20] sm:$0xff]  ;;  %v1954_v3 = vld [vmem:[#allocation7 + $0x198] sm:$0xff] }
 0x22a   : > { %1880 = vmatprep.mubr.f32.mxu1 %v2909_v0  ;;  %v1927_v0 = vld [vmem:[#allocation7 + $0xc0] sm:$0xff] }
 0x22b   : > { %1846 = vmatprep.subr.mxu1 %v3336_v5 }
 0x22c   : > { %1847 = vmatpush1.msra.mxu1 %v3340_v6 }
 0x22d   : > { %2543 = vmatmul.mubr.msk.f32.vlgmr.msra.gmra.mxu1 %vm521_vm0, %v3197_v56  ;;  %1979 = vmatprep.subr.mxu1 %v1934_v10  ;;  %v1922_v56 = vld [vmem:[#allocation7 + $0x98] sm:$0xff]  ;;  %v1953_v10 = vld [vmem:[#allocation7 + $0x190] sm:$0xff] }
 0x22e   : > { %1980 = vmatpush1.msra.mxu1 %v1933_v7  ;;  %v1952_v7 = vld [vmem:[#allocation7 + $0x188] sm:$0xff] }
 0x22f   : > { %1981 = vmatprep.subr.mxu1 %v1932_v11  ;;  %v1951_v11 = vld [vmem:[#allocation7 + $0x180] sm:$0xff] }
 0x230   : > { %1982 = vmatpush1.msra.mxu1 %v1931_v1  ;;  %v1950_v1 = vld [vmem:[#allocation7 + $0x178] sm:$0xff] }
 0x231   : > { %1983 = vmatprep.subr.mxu1 %v1930_v2  ;;  %v1949_v2 = vld [vmem:[#allocation7 + $0x170] sm:$0xff] }
 0x232   : > { %1984 = vmatpush1.msra.mxu1 %v1929_v15  ;;  %v1948_v15 = vld [vmem:[#allocation7 + $0x168] sm:$0xff] }
 0x233   : > { %1985 = vmatprep.subr.mxu1 %v1928_v12  ;;  %v1947_v12 = vld [vmem:[#allocation7 + $0x160] sm:$0xff] }
 0x234   : > { %1986 = vmatpush1.msra.mxu1 %v1927_v0  ;;  %v1946_v0 = vld [vmem:[#allocation7 + $0x158] sm:$0xff] }
 0x235   : > { %1987 = vmatprep.subr.mxu1 %v1926_v14  ;;  %v1945_v14 = vld [vmem:[#allocation7 + $0x150] sm:$0xff] }
 0x236   : > { %1988 = vmatpush1.msra.mxu1 %v1925_v4  ;;  %v1944_v4 = vld [vmem:[#allocation7 + $0x148] sm:$0xff] }
 0x237   : > { %1989 = vmatprep.subr.mxu1 %v1924_v39  ;;  %v1943_v39 = vld [vmem:[#allocation7 + $0x140] sm:$0xff] }
 0x238   : > { %1990 = vmatpush1.msra.mxu1 %v1923_v18  ;;  %v1942_v18 = vld [vmem:[#allocation7 + $0x138] sm:$0xff] }
 0x239   : > { %1991 = vmatprep.subr.mxu1 %v1922_v56  ;;  %v1941_v56 = vld [vmem:[#allocation7 + $0x130] sm:$0xff] }
 0x23a   : > { %1992 = vmatpush1.msra.mxu1 %v1921_v19  ;;  %v1940_v19 = vld [vmem:[#allocation7 + $0x128] sm:$0xff] }
 0x23b   : > { %1993 = vmatprep.subr.mxu1 %v1920_v41  ;;  %v1939_v41 = vld [vmem:[#allocation7 + $0x120] sm:$0xff] }
 0x23c   : > { %1994 = vmatpush1.msra.mxu1 %v1919_v47  ;;  %v1938_v47 = vld [vmem:[#allocation7 + $0x118] sm:$0xff] }
 0x23d   : > { %1995 = vmatprep.subr.mxu1 %v1918_v20  ;;  %v1937_v20 = vld [vmem:[#allocation7 + $0x110] sm:$0xff] }
 0x23e   : > { %1996 = vmatpush1.msra.mxu1 %v1917_v21  ;;  %v1936_v21 = vld [vmem:[#allocation7 + $0x108] sm:$0xff] }
 0x23f   : > { %1997 = vmatprep.subr.mxu1 %v1916_v49  ;;  %v1935_v49 = vld [vmem:[#allocation7 + $0x100] sm:$0xff] }
 0x240   : > { %1998 = vmatpush1.msra.mxu1 %v1915_v22 }
 0x241   : > { %1999 = vmatprep.subr.mxu1 %v1914_v55 }
 0x242   : > { %2000 = vmatpush1.msra.mxu1 %v1913_v23 }
 0x243   : > { %2001 = vmatprep.subr.mxu1 %v1912_v57 }
 0x244   : > { %2002 = vmatpush1.msra.mxu1 %v1911_v62 }
 0x245   : > { %2003 = vmatprep.subr.mxu1 %v1910_v24 }
 0x246   : > { %2004 = vmatpush1.msra.mxu1 %v1909_v63 }
 0x247   : > { %2005 = vmatprep.subr.mxu1 %v1908_v9 }
 0x248   : > { %2006 = vmatpush1.msra.mxu1 %v1907_v16 }
 0x249   : > { %2007 = vmatprep.subr.mxu1 %v1906_v13 }
 0x24a   : > { %2008 = vmatpush1.msra.mxu1 %v1905_v27 }
 0x24b   : > { %2009 = vmatprep.subr.mxu1 %v1904_v17 }
 0x24c   : > { %2010 = vmatpush1.msra.mxu1 %v1903_v30 }
 0x24d   : > { %2011 = vmatprep.subr.mxu1 %v1966_v31 }
 0x24e   : > { %2012 = vmatpush2.msra.mxu1 %v1965_v34 }
 0x24f   : > { %2013 = vmatprep.subr.mxu1 %v1964_v35 }
 0x250   : > { %2014 = vmatpush2.msra.mxu1 %v1963_v40 }
 0x251   : > { %2015 = vmatprep.subr.mxu1 %v1962_v38 }
 0x252   : > { %2016 = vmatpush2.msra.mxu1 %v1961_v45 }
 0x253   : > { %2017 = vmatprep.subr.mxu1 %v1960_v43 }
 0x254   : > { %2018 = vmatpush2.msra.mxu1 %v1959_v50 }
 0x255   : > { %2019 = vmatprep.subr.mxu1 %v1958_v51 }
 0x256   : > { %2020 = vmatpush2.msra.mxu1 %v1957_v54  ;;  %v2251_v54 = vld [vmem:[#allocation8 + $0xf0] sm:$0xff] }
 0x257   : > { %2021 = vmatprep.subr.mxu1 %v1956_v58  ;;  %v2235_v58 = vld [vmem:[#allocation8 + $0x70] sm:$0xff] }
 0x258   : > { %2022 = vmatpush2.msra.mxu1 %v1955_v61  ;;  %v2249_v61 = vld [vmem:[#allocation8 + $0xe0] sm:$0xff] }
 0x259   : > { %2023 = vmatprep.subr.mxu1 %v1954_v3  ;;  %v2233_v3 = vld [vmem:[#allocation8 + $0x60] sm:$0xff] }
 0x25a   : > { %2024 = vmatpush2.msra.mxu1 %v1953_v10  ;;  %v2247_v10 = vld [vmem:[#allocation8 + $0xd0] sm:$0xff] }
 0x25b   : > { %2025 = vmatprep.subr.mxu1 %v1952_v7  ;;  %v2231_v7 = vld [vmem:[#allocation8 + $0x50] sm:$0xff] }
 0x25c   : > { %2026 = vmatpush2.msra.mxu1 %v1951_v11  ;;  %v2246_v11 = vld [vmem:[#allocation8 + $0xc8] sm:$0xff] }
 0x25d   : > { %2027 = vmatprep.subr.mxu1 %v1950_v1  ;;  %v2230_v1 = vld [vmem:[#allocation8 + $0x48] sm:$0xff] }
 0x25e   : > { %2028 = vmatpush2.msra.mxu1 %v1949_v2  ;;  %v2245_v2 = vld [vmem:[#allocation8 + $0xc0] sm:$0xff] }
 0x25f   : > { %2029 = vmatprep.subr.mxu1 %v1948_v15  ;;  %v2229_v15 = vld [vmem:[#allocation8 + $0x40] sm:$0xff] }
 0x260   : > { %2030 = vmatpush2.msra.mxu1 %v1947_v12  ;;  %v2244_v12 = vld [vmem:[#allocation8 + $0xb8] sm:$0xff] }
 0x261   : > { %2031 = vmatprep.subr.mxu1 %v1946_v0  ;;  %v2228_v0 = vld [vmem:[#allocation8 + $0x38] sm:$0xff] }
 0x262   : > { %2032 = vmatpush2.msra.mxu1 %v1945_v14  ;;  %v2243_v14 = vld [vmem:[#allocation8 + $0xb0] sm:$0xff] }
 0x263   : > { %2033 = vmatprep.subr.mxu1 %v1944_v4  ;;  %v2227_v4 = vld [vmem:[#allocation8 + $0x30] sm:$0xff] }
 0x264   : > { %2034 = vmatpush2.msra.mxu1 %v1943_v39  ;;  %v2242_v39 = vld [vmem:[#allocation8 + $0xa8] sm:$0xff] }
 0x265   : > { %2035 = vmatprep.subr.mxu1 %v1942_v18  ;;  %v2226_v18 = vld [vmem:[#allocation8 + $0x28] sm:$0xff] }
 0x266   : > { %2036 = vmatpush2.msra.mxu1 %v1941_v56  ;;  %v2241_v56 = vld [vmem:[#allocation8 + $0xa0] sm:$0xff] }
 0x267   : > { %2037 = vmatprep.subr.mxu1 %v1940_v19  ;;  %v2225_v19 = vld [vmem:[#allocation8 + $0x20] sm:$0xff] }
 0x268   : > { %2038 = vmatpush2.msra.mxu1 %v1939_v41  ;;  %v2240_v41 = vld [vmem:[#allocation8 + $0x98] sm:$0xff] }
 0x269   : > { %2039 = vmatprep.subr.mxu1 %v1938_v47  ;;  %v2224_v47 = vld [vmem:[#allocation8 + $0x18] sm:$0xff] }
 0x26a   : > { %2040 = vmatpush2.msra.mxu1 %v1937_v20  ;;  %v2239_v20 = vld [vmem:[#allocation8 + $0x90] sm:$0xff] }
 0x26b   : > { %2041 = vmatprep.subr.mxu1 %v1936_v21  ;;  %v2223_v21 = vld [vmem:[#allocation8 + $0x10] sm:$0xff] }
 0x26c   : > { %2042 = vmatpush2.msra.mxu1 %v1935_v49  ;;  %v2238_v49 = vld [vmem:[#allocation8 + $0x88] sm:$0xff] }
 0x2d1   : > { %v1385_v22 = vpop.f32.mrf.mxu1 }
 0x2d2   : > { %v1887_v57 = vadd.f32 %v1385_v22, %v3278_v29  ;;  %v2222_v22 = vld [vmem:[#allocation8 + $0x8] sm:$0xff] }
 0x2d3   : > { %v1387_v55 = vpop.f32.mrf.mxu1 }
 0x2d4   : > { %v1888_v23 = vadd.f32 %v1387_v55, %v3276_v28  ;;  %v2237_v55 = vld [vmem:[#allocation8 + $0x80] sm:$0xff] }
 0x2d5   : > { %v1456_v62 = vpop.f32.mrf.mxu1 }
 0x2d6   : > { %2043 = vmatprep.mubr.f32.mxu1 %v1888_v23  ;;  %v1889_v9 = vadd.f32 %v1456_v62, %v3286_v33  ;;  %v2221_v23 = vld [vmem:[#allocation8] sm:$0xff] }
 0x2d7   : > { %v1458_v24 = vpop.f32.mrf.mxu1  ;;  %2044 = vmatmul.mubr.f32.vlgmr.msra.gmra.mxu1 %v1887_v57  ;;  %v1967_v57 = vld [vmem:[%s3479_s6] sm:$0x3] }
 0x2d8   : > { %v1890_v63 = vadd.f32 %v1458_v24, %v3282_v32  ;;  %v3368_v62 = vrot.slane %v1967_v57, %v1198_v26  ;;  %v3372_v24 = vrot.slane %v1967_v57, %v1202_v8  ;;  %v2707_v8 = vld [vmem:[%s3109_s22 + $0x10] sm:$0xff] }
 0x2d9   : > { %v1527_v16 = vpop.f32.mrf.mxu1 }
 0x2da   : > { %2049 = vmatprep.mubr.f32.mxu1 %v1890_v63  ;;  %v1891_v17 = vadd.f32 %v1527_v16, %v3295_v37 }
 0x2db   : > { %v1529_v13 = vpop.f32.mrf.mxu1  ;;  %2050 = vmatmul.mubr.f32.gmra.mxu1 %v1889_v9 }
 0x2dc   : > { %v1892_v27 = vadd.f32 %v1529_v13, %v3291_v36  ;;  %v2705_v13 = vld [vmem:[%s3109_s22] sm:$0xff] }
 0x2dd   : > { %v1598_v30 = vpop.f32.mrf.mxu1 }
 0x2de   : > { %2055 = vmatprep.mubr.f32.mxu1 %v1892_v27  ;;  %v1893_v31 = vadd.f32 %v1598_v30, %v3304_v44 }
 0x2df   : > { %v1600_v28 = vpop.f32.mrf.mxu1  ;;  %2056 = vmatmul.mubr.f32.gmra.mxu1 %v1891_v17 }
 0x2e0   : > { %v1894_v29 = vadd.f32 %v1600_v28, %v3300_v42  ;;  %v2706_v28 = vld [vmem:[%s3109_s22 + $0x8] sm:$0xff] }
 0x2e1   : > { %v1669_v34 = vpop.f32.mrf.mxu1 }
 0x2e2   : > { %2061 = vmatprep.mubr.f32.mxu1 %v1894_v29  ;;  %v1895_v35 = vadd.f32 %v1669_v34, %v3313_v48 }
 0x2e3   : > { %v1671_v32 = vpop.f32.mrf.mxu1  ;;  %2062 = vmatmul.mubr.f32.gmra.mxu1 %v1893_v31 }
 0x2e4   : > { %v1896_v33 = vadd.f32 %v1671_v32, %v3309_v46 }
 0x2e5   : > { %v1740_v40 = vpop.f32.mrf.mxu1 }
 0x2e6   : > { %2067 = vmatprep.mubr.f32.mxu1 %v1896_v33  ;;  %v1897_v38 = vadd.f32 %v1740_v40, %v3322_v53  ;;  %v2236_v53 = vld [vmem:[#allocation8 + $0x78] sm:$0xff] }
 0x2e7   : > { %v1742_v36 = vpop.f32.mrf.mxu1  ;;  %2068 = vmatmul.mubr.f32.gmra.mxu1 %v1895_v35 }
 0x2e8   : > { %v1898_v37 = vadd.f32 %v1742_v36, %v3318_v52  ;;  %v2252_v52 = vld [vmem:[#allocation8 + $0xf8] sm:$0xff] }
 0x2e9   : > { %v1811_v45 = vpop.f32.mrf.mxu1  ;;  %2567 = vmatprep.subr.mxu0 %v2252_v52 }
 0x2ea   : > { %2073 = vmatprep.mubr.f32.mxu1 %v1898_v37  ;;  %v1899_v43 = vadd.f32 %v1811_v45, %v3331_v60  ;;  %2568 = vmatpush3.msra.mxu0 %v2236_v53  ;;  %v2234_v60 = vld [vmem:[#allocation8 + $0x68] sm:$0xff]  ;;  %v2708_v37 = vld [vmem:[%s3109_s22 + $0x18] sm:$0xff] }
 0x2eb   : > { %v1813_v42 = vpop.f32.mrf.mxu1  ;;  %2074 = vmatmul.mubr.f32.gmra.mxu1 %v1897_v38  ;;  %2569 = vmatprep.subr.mxu0 %v2251_v54 }
 0x2ec   : > { %v1900_v44 = vadd.f32 %v1813_v42, %v3327_v59  ;;  %2570 = vmatpush3.msra.mxu0 %v2235_v58  ;;  %v2250_v59 = vld [vmem:[#allocation8 + $0xe8] sm:$0xff] }
 0x2ed   : > { %v1882_v50 = vpop.f32.mrf.mxu1  ;;  %2571 = vmatprep.subr.mxu0 %v2250_v59 }
 0x2ee   : > { %2079 = vmatprep.mubr.f32.mxu1 %v1900_v44  ;;  %v1901_v51 = vadd.f32 %v1882_v50, %v3340_v6  ;;  %2572 = vmatpush3.msra.mxu0 %v2234_v60  ;;  %v2232_v6 = vld [vmem:[#allocation8 + $0x58] sm:$0xff]  ;;  %v2710_v60 = vld [vmem:[%s3109_s22 + $0x28] sm:$0xff] }
 0x2ef   : > { %v1884_v46 = vpop.f32.mrf.mxu1  ;;  %2080 = vmatmul.mubr.f32.gmra.mxu1 %v1899_v43  ;;  %2573 = vmatprep.subr.mxu0 %v2249_v61 }
 0x2f0   : > { %v1902_v48 = vadd.f32 %v1884_v46, %v3336_v5  ;;  %2574 = vmatpush3.msra.mxu0 %v2233_v3  ;;  %v2248_v5 = vld [vmem:[#allocation8 + $0xd8] sm:$0xff] }
 0x2f1   : > { %2575 = vmatprep.subr.mxu0 %v2248_v5 }
 0x2f2   : > { %2085 = vmatprep.mubr.f32.mxu1 %v1902_v48  ;;  %2576 = vmatpush3.msra.mxu0 %v2232_v6  ;;  %v2709_v48 = vld [vmem:[%s3109_s22 + $0x20] sm:$0xff] }
 0x2f3   : > { %2086 = vmatmul.mubr.f32.gmra.mxu1 %v1901_v51  ;;  %2577 = vmatprep.subr.mxu0 %v2247_v10 }
 0x2f4   : > { %2578 = vmatpush3.msra.mxu0 %v2231_v7 }
 0x2f5   : > { %2579 = vmatprep.subr.mxu0 %v2246_v11 }
 0x2f6   : > { %2580 = vmatpush3.msra.mxu0 %v2230_v1 }
 0x2f7   : > { %2581 = vmatprep.subr.mxu0 %v2245_v2  ;;  %v2711_v2 = vld [vmem:[%s3109_s22 + $0x30] sm:$0xff] }
 0x2f8   : > { %2582 = vmatpush3.msra.mxu0 %v2229_v15 }
 0x2f9   : > { %2583 = vmatprep.subr.mxu0 %v2244_v12 }
 0x2fa   : > { %2584 = vmatpush3.msra.mxu0 %v2228_v0 }
 0x2fb   : > { %2585 = vmatprep.subr.mxu0 %v2243_v14 }
 0x2fc   : > { %2586 = vmatpush3.msra.mxu0 %v2227_v4 }
 0x2fd   : > { %2587 = vmatprep.subr.mxu0 %v2242_v39 }
 0x2fe   : > { %2588 = vmatpush3.msra.mxu0 %v2226_v18  ;;  %v2712_v18 = vld [vmem:[%s3109_s22 + $0x38] sm:$0xff] }
 0x2ff   : > { %2589 = vmatprep.subr.mxu0 %v2241_v56 }
 0x300   : > { %2590 = vmatpush3.msra.mxu0 %v2225_v19 }
 0x301   : > { %2591 = vmatprep.subr.mxu0 %v2240_v41 }
 0x302   : > { %2592 = vmatpush3.msra.mxu0 %v2224_v47 }
 0x303   : > { %2593 = vmatprep.subr.mxu0 %v2239_v20 }
 0x304   : > { %2594 = vmatpush3.msra.mxu0 %v2223_v21 }
 0x305   : > { %2595 = vmatprep.subr.mxu0 %v2238_v49 }
 0x306   : > { %2596 = vmatpush3.msra.mxu0 %v2222_v22 }
 0x307   : > { %2597 = vmatprep.subr.mxu0 %v2237_v55 }
 0x308   : > { %2598 = vmatpush3.msra.mxu0 %v2221_v23  ;;  %v2713_v23 = vld [vmem:[%s3109_s22 + $0x40] sm:$0xff] }
 0x397   : > { %v2045_v63 = vpop.f32.mrf.mxu1 }
 0x398   : > { %v2046_v9 = vadd.f32 %v2045_v63, %v3368_v62 }
 0x399   : > { %v2047_v16 = vpop.f32.mrf.mxu1 }
 0x39a   : > { %v2092_v27 = vadd.f32 %v2705_v13, %v2046_v9  ;;  %v2048_v17 = vadd.f32 %v2047_v16, %v3372_v24 }
 0x39b   : > { %v2051_v30 = vpop.f32.mrf.mxu1 }
 0x39c   : > { %v2093_v29 = vadd.f32 %v2706_v28, %v2048_v17  ;;  %v2052_v31 = vadd.f32 %v2051_v30, %v3368_v62  ;;  %v2108_v34 = vrot.slane %v2092_v27, 4  ;;  %v2714_v28 = vld [vmem:[%s3109_s22 + $0x48] sm:$0xff] }
 0x39d   : > { %v2053_v26 = vpop.f32.mrf.mxu1 }
 0x39e   : > { %v2114_v25 = vrot.slane %v2093_v29, 4  ;;  %v2094_v32 = vadd.f32 %v2707_v8, %v2052_v31  ;;  %v2054_v33 = vadd.f32 %v2053_v26, %v3372_v24  ;;  %v2109_v44 = vadd.f32 %v2108_v34, %v2092_v27 }
 0x39f   : > { %v2057_v35 = vpop.f32.mrf.mxu1 }
 0x3a0   : > { %v2115_v40 = vadd.f32 %v2114_v25, %v2093_v29  ;;  %v2120_v36 = vrot.slane %v2094_v32, 4  ;;  %v2095_v38 = vadd.f32 %v2708_v37, %v2054_v33  ;;  %v2058_v45 = vadd.f32 %v2057_v35, %v3368_v62 }
 0x3a1   : > { %v2059_v42 = vpop.f32.mrf.mxu1  ;;  %v2110_v6 = vrot.slane %v2109_v44, 2 }
 0x3a2   : > { %v2116_v43 = vrot.slane %v2115_v40, 2  ;;  %v2121_v50 = vadd.f32 %v2120_v36, %v2094_v32  ;;  %v2126_v46 = vrot.slane %v2095_v38, 4  ;;  %v2096_v51 = vadd.f32 %v2709_v48, %v2058_v45 }
 0x3a3   : > { %v2060_v52 = vadd.f32 %v2059_v42, %v3372_v24  ;;  %v2063_v53 = vpop.f32.mrf.mxu1  ;;  %v2111_v41 = vadd.f32 %v2110_v6, %v2109_v44  ;;  %v2715_v44 = vld [vmem:[%s3109_s22 + $0x50] sm:$0xff] }
 0x3a4   : > { %v2122_v54 = vrot.slane %v2121_v50, 2  ;;  %v2127_v58 = vadd.f32 %v2126_v46, %v2095_v38  ;;  %v2132_v59 = vrot.slane %v2096_v51, 4  ;;  %v2064_v3 = vadd.f32 %v2063_v53, %v3368_v62 }
 0x3a5   : > { %v2097_v61 = vadd.f32 %v2710_v60, %v2060_v52  ;;  %v2065_v5 = vpop.f32.mrf.mxu1  ;;  %v2117_v10 = vadd.f32 %v2116_v43, %v2115_v40  ;;  %v2112_v31 = vrot.slane %v2111_v41, 1  ;;  %v2716_v60 = vld [vmem:[%s3109_s22 + $0x58] sm:$0xff] }
 0x3a6   : > { %v2128_v7 = vrot.slane %v2127_v58, 2  ;;  %v2123_v11 = vadd.f32 %v2122_v54, %v2121_v50  ;;  %v2133_v1 = vadd.f32 %v2132_v59, %v2096_v51  ;;  %v2098_v15 = vadd.f32 %v2711_v2, %v2064_v3 }
 0x3a7   : > { %v2066_v12 = vadd.f32 %v2065_v5, %v3372_v24  ;;  %v2069_v0 = vpop.f32.mrf.mxu1  ;;  %v2138_v39 = vrot.slane %v2097_v61, 4  ;;  %v2118_v20 = vrot.slane %v2117_v10, 1  ;;  %v3397_v46 = vadd.f32 %v2112_v31, %v2111_v41 }
 0x3a8   : > { %v2129_v14 = vadd.f32 %v2128_v7, %v2127_v58  ;;  %v2134_v4 = vrot.slane %v2133_v1, 2  ;;  %v2070_v47 = vadd.f32 %v2069_v0, %v3368_v62  ;;  %v2124_v21 = vrot.slane %v2123_v11, 1  ;;  %v2717_v0 = vld [vmem:[%s3109_s22 + $0x60] sm:$0xff] }
 0x3a9   : > { %v2099_v56 = vadd.f32 %v2712_v18, %v2066_v12  ;;  %v2071_v19 = vpop.f32.mrf.mxu1  ;;  %v2144_v49 = vrot.slane %v2098_v15, 4  ;;  %v2139_v13 = vadd.f32 %v2138_v39, %v2097_v61  ;;  %v2119_v26 = vadd.f32 %v2118_v20, %v2117_v10 }
 0x3aa   : > { %v2100_v57 = vadd.f32 %v2713_v23, %v2070_v47  ;;  %v2072_v63 = vadd.f32 %v2071_v19, %v3372_v24  ;;  %v2130_v9 = vrot.slane %v2129_v14, 1  ;;  %v2135_v16 = vadd.f32 %v2134_v4, %v2133_v1  ;;  %v2718_v4 = vld [vmem:[%s3109_s22 + $0x68] sm:$0xff] }
 0x3ab   : > { %v2150_v22 = vrot.slane %v2099_v56, 4  ;;  %v2075_v55 = vpop.f32.mrf.mxu1  ;;  %v2125_v34 = vadd.f32 %v2124_v21, %v2123_v11  ;;  %v2145_v25 = vadd.f32 %v2144_v49, %v2098_v15  ;;  %v2140_v37 = vrot.slane %v2139_v13, 2  ;;  %v2719_v49 = vld [vmem:[%s3109_s22 + $0x70] sm:$0xff] }
 0x3ac   : > { %v2156_v30 = vrot.slane %v2100_v57, 4  ;;  %v2101_v29 = vadd.f32 %v2714_v28, %v2072_v63  ;;  %v2076_v35 = vadd.f32 %v2075_v55, %v3368_v62  ;;  %v2131_v40 = vadd.f32 %v2130_v9, %v2129_v14 }
 0x3ad   : > { %v2077_v27 = vpop.f32.mrf.mxu1  ;;  %v2151_v17 = vadd.f32 %v2150_v22, %v2099_v56  ;;  %v2136_v36 = vrot.slane %v2135_v16, 1  ;;  %v3399_v48 = vmul.f32 0.125, %v2119_v26  ;;  %v3401_v51 = vmul.f32 0.125, %v2125_v34 }
 0x3ae   : > { %v2157_v32 = vadd.f32 %v2156_v30, %v2100_v57  ;;  %v2162_v33 = vrot.slane %v2101_v29, 4  ;;  %v2102_v43 = vadd.f32 %v2715_v44, %v2076_v35  ;;  %v2078_v50 = vadd.f32 %v2077_v27, %v3372_v24 }
 0x3af   : > { %v2081_v8 = vpop.f32.mrf.mxu1  ;;  %v2152_v45 = vrot.slane %v2151_v17, 2  ;;  %v2146_v52 = vrot.slane %v2145_v25, 2  ;;  %v3404_v3 = vmul.f32 0.125, %v2131_v40  ;;  %v2141_v5 = vadd.f32 %v2140_v37, %v2139_v13 }
 0x3b0   : > { %v2163_v42 = vadd.f32 %v2162_v33, %v2101_v29  ;;  %v2158_v54 = vrot.slane %v2157_v32, 2  ;;  %v2168_v59 = vrot.slane %v2102_v43, 4  ;;  %v2103_v61 = vadd.f32 %v2716_v60, %v2078_v50 }
 0x3b1   : > { %v2083_v38 = vpop.f32.mrf.mxu1  ;;  %v2082_v6 = vadd.f32 %v2081_v8, %v3368_v62  ;;  %v2137_v7 = vadd.f32 %v2136_v36, %v2135_v16  ;;  %v2153_v11 = vadd.f32 %v2152_v45, %v2151_v17  ;;  %v2147_v12 = vadd.f32 %v2146_v52, %v2145_v25 }
 0x3b2   : > { %v2164_v58 = vrot.slane %v2163_v42, 2  ;;  %v2084_v10 = vadd.f32 %v2083_v38, %v3372_v24  ;;  %v2169_v1 = vadd.f32 %v2168_v59, %v2102_v43  ;;  %v2174_v2 = vrot.slane %v2103_v61, 4 }
 0x3b3   : > { %v2087_v53 = vpop.f32.mrf.mxu1  ;;  %v2104_v14 = vadd.f32 %v2717_v0, %v2082_v6  ;;  %v2159_v56 = vadd.f32 %v2158_v54, %v2157_v32  ;;  %v2142_v23 = vrot.slane %v2141_v5, 1  ;;  %v2154_v57 = vrot.slane %v2153_v11, 1 }
 0x3b4   : > { %v2105_v39 = vadd.f32 %v2718_v4, %v2084_v10  ;;  %v2088_v18 = vadd.f32 %v2087_v53, %v3368_v62  ;;  %v2165_v19 = vadd.f32 %v2164_v58, %v2163_v42  ;;  %v2170_v41 = vrot.slane %v2169_v1, 2  ;;  %v2720_v62 = vld [vmem:[%s3109_s22 + $0x78] sm:$0xff] }
 0x3b5   : > { %v2089_v15 = vpop.f32.mrf.mxu1  ;;  %v2175_v47 = vadd.f32 %v2174_v2, %v2103_v61  ;;  %v2180_v20 = vrot.slane %v2104_v14, 4  ;;  %v2148_v30 = vrot.slane %v2147_v12, 1  ;;  %v2160_v28 = vrot.slane %v2159_v56, 1 }
 0x3b6   : > { %v2186_v21 = vrot.slane %v2105_v39, 4  ;;  %v2106_v22 = vadd.f32 %v2719_v49, %v2088_v18  ;;  %v2090_v55 = vadd.f32 %v2089_v15, %v3372_v24  ;;  %v2171_v63 = vadd.f32 %v2170_v41, %v2169_v1 }
 0x3b7   : > { %v2176_v9 = vrot.slane %v2175_v47, 2  ;;  %v2181_v16 = vadd.f32 %v2180_v20, %v2104_v14  ;;  %v2166_v29 = vrot.slane %v2165_v19, 1  ;;  %v2143_v24 = vadd.f32 %v2142_v23, %v2141_v5 }
 0x3b8   : > { %v2187_v13 = vadd.f32 %v2186_v21, %v2105_v39  ;;  %v2192_v27 = vrot.slane %v2106_v22, 4  ;;  %v2107_v17 = vadd.f32 %v2720_v62, %v2090_v55  ;;  %v2155_v32 = vadd.f32 %v2154_v57, %v2153_v11 }
 0x3b9   : > { %v2177_v31 = vadd.f32 %v2176_v9, %v2175_v47  ;;  %v2182_v26 = vrot.slane %v2181_v16, 2  ;;  %v2172_v33 = vrot.slane %v2171_v63, 1  ;;  %v2149_v45 = vadd.f32 %v2148_v30, %v2147_v12 }
 0x3ba   : > { %v2188_v34 = vrot.slane %v2187_v13, 2  ;;  %v2193_v25 = vadd.f32 %v2192_v27, %v2106_v22  ;;  %v2198_v8 = vrot.slane %v2107_v17, 4  ;;  %v2161_v42 = vadd.f32 %v2160_v28, %v2159_v56 }
 0x3bb   : > { %v2178_v35 = vrot.slane %v2177_v31, 1  ;;  %v2183_v40 = vadd.f32 %v2182_v26, %v2181_v16  ;;  %v2167_v44 = vadd.f32 %v2166_v29, %v2165_v19  ;;  %v2209_v58 = vmul.f32 0.125, %v2137_v7 }
 0x3bc   : > { %v2189_v36 = vadd.f32 %v2188_v34, %v2187_v13  ;;  %v2194_v37 = vrot.slane %v2193_v25, 2  ;;  %v2199_v38 = vadd.f32 %v2198_v8, %v2107_v17  ;;  %v2210_v59 = vmul.f32 0.125, %v2143_v24  ;;  %v2544_v13 = vld [vmem:[%s3481_s8] ss:$0 sm:$0xff] }
 0x3bd   : > { %v2179_v43 = vadd.f32 %v2178_v35, %v2177_v31  ;;  %v2184_v50 = vrot.slane %v2183_v40, 1  ;;  %v2212_v60 = vmul.f32 0.125, %v2155_v32  ;;  %v2173_v61 = vadd.f32 %v2172_v33, %v2171_v63 }
 0x3be   : > { %v2190_v52 = vrot.slane %v2189_v36, 1  ;;  %v2195_v53 = vadd.f32 %v2194_v37, %v2193_v25  ;;  %v2200_v54 = vrot.slane %v2199_v38, 2  ;;  %v2205_v1 = vmul.f32 0.125, %v3397_v46 }
 0x3bf   : > { %v2185_v5 = vadd.f32 %v2184_v50, %v2183_v40  ;;  %v2290_v2 = vsel %vm2276_vm1, %v3404_v3, %v3399_v48  ;;  %v2211_v15 = vmul.f32 0.125, %v2149_v45  ;;  %v2214_v12 = vmul.f32 0.125, %v2167_v44 }
 0x3c0   : > { %v2191_v6 = vadd.f32 %v2190_v52, %v2189_v36  ;;  %v2196_v10 = vrot.slane %v2195_v53, 1  ;;  %v2201_v11 = vadd.f32 %v2200_v54, %v2199_v38  ;;  %v2213_v0 = vmul.f32 0.125, %v2161_v42 }
 0x3c1   : > { %v2216_v14 = vmul.f32 0.125, %v2179_v43  ;;  %v2277_v7 = vsel %vm2276_vm1, %v3401_v51, %v2205_v1  ;;  %v2215_v18 = vmul.f32 0.125, %v2173_v61  ;;  %v2291_v19 = vsel %vm2278_vm2, %v2210_v59, %v2290_v2 }
 0x3c2   : > { %v2197_v4 = vadd.f32 %v2196_v10, %v2195_v53  ;;  %v2202_v39 = vrot.slane %v2201_v11, 1  ;;  %v2218_v56 = vmul.f32 0.125, %v2191_v6  ;;  %v2279_v41 = vsel %vm2278_vm2, %v2209_v58, %v2277_v7 }
 0x3c3   : > { %v2217_v46 = vmul.f32 0.125, %v2185_v5  ;;  %v2292_v20 = vsel %vm2280_vm3, %v2212_v60, %v2291_v19  ;;  %v2281_v21 = vsel %vm2280_vm3, %v2211_v15, %v2279_v41 }
 0x3c4   : > { %v2203_v47 = vadd.f32 %v2202_v39, %v2201_v11  ;;  %v2219_v48 = vmul.f32 0.125, %v2197_v4  ;;  %v2293_v3 = vsel %vm2282_vm4, %v2214_v12, %v2292_v20  ;;  %v2283_v22 = vsel %vm2282_vm4, %v2213_v0, %v2281_v21 }
 0x3c5   : > { %v2294_v51 = vsel %vm2284_vm5, %v2216_v14, %v2293_v3  ;;  %v2285_v23 = vsel %vm2284_vm5, %v2215_v18, %v2283_v22 }
 0x3c6   : > { %v2220_v49 = vmul.f32 0.125, %v2203_v47  ;;  %v2295_v55 = vsel %vm2286_vm6, %v2218_v56, %v2294_v51  ;;  %v2287_v63 = vsel %vm2286_vm6, %v2217_v46, %v2285_v23 }
 0x3c7   : > { %v2289_v9 = vsel %vm2288_vm7, %v2219_v48, %v2287_v63 }
 0x3c8   : > { %v2296_v57 = vsel %vm2288_vm7, %v2220_v49, %v2295_v55 }
 0x3c9   : > { %2363 = vmatprep.mubr.f32.mxu0 %v2296_v57 }
 0x3ca   : > { %2364 = vmatmul.mubr.f32.vlgmr.msra.gmra.mxu0 %v2289_v9 }
 0x48a   : > { %v2599_v16 = vpop.f32.mrf.mxu0 }
 0x48c   : > { %v2600_v27 = vpop.f32.mrf.mxu0 }
 0x48d   : > { %v2601_v62 = vadd.f32 %v2600_v27, %v2599_v16 }
 0x48f   : > { %v2366_v17 = vadd.f32 %v2601_v62, %v2544_v13 }
 0x491   : > { %2703 = vtanh.f32 %v2366_v17 }
 0x49e   : > { %v2704_v30 = vpop.eup %2703 }
 0x49f   : > { %2370 = vst [vmem:[%s427_s27] sm:$0xff] %v2704_v30 }
 0x4a0   : > { %2840 = shalt.err (!%p2837_p6)
}
 0x4a1   : > { %s2841_s24 = scalar_lea.hbm %s3436_s20, 128  ;;  %s2845_s17 = scalar_lea.hbm %s3482_s9, 256 }
 0x4a2   : > { %p2842_p4 = scmp.ne.s32.totalorder %s3436_s20, %s2841_s24  ;;  %p2846_p11 = scmp.lt.s32.totalorder %s3436_s20, %s3482_s9 }
 0x4a3   : > { %p2847_p5 = scmp.lt.s32.totalorder %s2845_s17, %s2841_s24 }
 0x4a4   : > { %p2843_p8 = pnand %p2842_p4, %p3509_p12 }
 0x4a5   : > { %p2848_p7 = por %p2847_p5, %p2846_p11 }
 0x4a6   : > { %p2844_p3 = pneg %p2843_p8 }
 0x4a8   : > { %p2849_p1 = pnand %p2848_p7, %p2844_p3 }
 0x4aa   : > { %2852 = shalt.err (!%p2849_p1)
}
 0x4ab   : > { %2619 = dma.vmem_to_hbm [thread:$0]  (%p3509_p12), %s2386_s28, 128, %s3436_s20, %s2372_s25  }
 0x4ac PF: > { %s2397_s27 = sand.u32 1, %s2887_s30   ;;  %p3510_p9 = scmp.ne.s32.totalorder %s3493_s16, 0 }
 0x4ad   : > { %p3511_p13 = scmp.ge.s32.totalorder %s2899_s12, 2  ;;  %s2398_s18 = scalar_lea.sflag [#allocation4], %s2397_s27 }
 0x4af   : > { %p2636_p0 = pnand %p3511_p13, %p3510_p9 }
 0x4b1   : > { %p2637_p2 = pneg %p2636_p0 }
 0x4b3   : > { %2882 = dma.done.wait (%p2637_p2), %s2398_s18, 128  }
 0x4b4   : > { %2884 = vsyncadd (%p2637_p2), %s2398_s18, 4294967168  ;;  %p24_p10 = scmp.ge.s32.totalorder %s3047_s29, 4   ;;  %s3512_s30 = smov %s2891_s10 }
 0x4b5   : > { %s3513_s10 = smov %s2895_s11  ;;  %s3514_s11 = smov %s3057_s21 }
 0x4b6   : > { %s3515_s12 = smov %s3047_s29  ;;  %26 = sbr.rel (!%p24_p10) target bundleno = 11 (0xb), region = 119 }
 0x4bb   :  { %2403 = vsyncpa [#allocation3], 1 }
 0x4bc   :  { %2405 = vsyncpa [#allocation3 + $0x1], 1 }
 0x4bd   :  { %2406 = vsyncpa [#allocation6], 1 }
 0x4be   :  { %2407 = vsyncpa [#allocation9], 1 }
 0x4bf   :  { %2408 = vsyncpa [#allocation4], 1 }
 0x4c0   :  { %2410 = vsyncpa [#allocation4 + $0x1], 1 }

</bundles_post_ra>
